<compile_context>
chip_gen: v5e
topology: v5e:2x2
jax: 0.10.0
libtpu: 0.0.40
codegen_flags: <defaults>
</compile_context>

<pallas_src>
import jax
import jax.numpy as jnp
from jax import lax
from jax.experimental import pallas as pl
from jax.experimental.pallas import tpu as pltpu


def _ceil_to(x, m):
    return -(-x // m) * m


def _make_lstm_kernel(S, Sp, H, Lp):
    """Recurrence kernel factory. S, Sp, H, Lp are static Python ints."""
    n_full = S // 8
    rem = S - n_full * 8
    # align gate blocks onto lanes [0:H) (np.roll semantics: +shift -> higher idx)
    sf = (Lp - 1 * H) % Lp
    sg = (Lp - 2 * H) % Lp
    so = (Lp - 3 * H) % Lp

    def kernel(tok_ref, wih_ref, whh_ref, h0_ref, c0_ref,
               hs_ref, hn_ref, cn_ref,
               h_sc, c_sc, tile_sc):
        h_sc[...] = h0_ref[...]
        c_sc[...] = c0_ref[...]

        def cell(t):
            tok = tok_ref[t]                               # scalar from SMEM
            # one_hot(tok) @ W_ih + (b_ih + b_hh) == bias-folded row gather.
            xw = wih_ref[pl.ds(tok, 1), :]                 # (1, Lp)
            gates = xw + jnp.dot(h_sc[...], whh_ref[...],
                                 preferred_element_type=jnp.float32)
            sig = jax.nn.sigmoid(gates)                    # i|f|.|o lanes
            tah = jnp.tanh(gates)                          # .|.|g|. lanes
            f_g = pltpu.roll(sig, sf, 1)                   # f -> lanes [0:H)
            g_g = pltpu.roll(tah, sg, 1)                   # g -> lanes [0:H)
            o_g = pltpu.roll(sig, so, 1)                   # o -> lanes [0:H)
            c_new = f_g * c_sc[...] + sig * g_g            # i already at [0:H)
            h_new = o_g * jnp.tanh(c_new)
            c_sc[...] = c_new
            h_sc[...] = h_new
            return h_new

        def run_group(base, n_steps):                      # n_steps static
            for j in range(n_steps):
                tile_sc[pl.ds(j, 1), :] = cell(base + j)

        if n_full > 0:
            def group_body(g, carry):
                base = pl.multiple_of(g * 8, 8)
                run_group(base, 8)
                hs_ref[pl.ds(base, 8), :] = tile_sc[...]   # one aligned store / 8 steps
                return carry
            lax.fori_loop(0, n_full, group_body, 0)

        if rem > 0:                                        # static tail
            base = n_full * 8
            tile_sc[...] = jnp.zeros_like(tile_sc)
            run_group(base, rem)
            hs_ref[pl.ds(base, 8), :] = tile_sc[...]

        written = _ceil_to(S, 8)
        if Sp > written:                                   # head-tile padding rows
            hs_ref[pl.ds(written, Sp - written), :] = jnp.zeros(
                (Sp - written, Lp), jnp.float32)

        hn_ref[...] = h_sc[...]
        cn_ref[...] = c_sc[...]

    return kernel


def _head_kernel(hs_ref, w1_ref, b1_ref, w2_ref, b2_ref, out_ref):
    # relu(lstm_out) -> relu(out1) -> out2, per row tile (embarrassingly parallel)
    hs = jnp.maximum(hs_ref[...], 0.0)
    z1 = jnp.maximum(
        jnp.dot(hs, w1_ref[...], preferred_element_type=jnp.float32)
        + b1_ref[...], 0.0)
    out_ref[...] = (jnp.dot(z1, w2_ref[...], preferred_element_type=jnp.float32)
                    + b2_ref[...])


def init_params(key, hidden_size, max_length):
    """PyTorch-semantic (unpadded) parameters, stored transposed (in, out)."""
    H, I = hidden_size, max_length
    ks = jax.random.split(key, 8)
    k_lstm = 1.0 / jnp.sqrt(H)
    k1 = 1.0 / jnp.sqrt(H)
    k2 = 1.0 / jnp.sqrt(H // 2)
    u = lambda k, shape, a: jax.random.uniform(k, shape, jnp.float32, -a, a)
    return dict(
        w_ih=u(ks[0], (I, 4 * H), k_lstm),
        w_hh=u(ks[1], (H, 4 * H), k_lstm),
        b=u(ks[2], (1, 4 * H), k_lstm) + u(ks[3], (1, 4 * H), k_lstm),  # b_ih+b_hh
        w1=u(ks[4], (H, H // 2), k1),
        b1=u(ks[5], (1, H // 2), k1),
        w2=u(ks[6], (H // 2, 1), k2),
        b2=u(ks[7], (1, 1), k2),
    )


def pack_params(params, hidden_size, max_length):
    """Pad to lane-aligned, gate-compacted kernel layout."""
    H = hidden_size
    H1 = H // 2
    I = max_length
    GL = 4 * H                              # compact gate width (i|f|g|o)
    Lp = max(128, _ceil_to(GL, 128))
    H1p = max(128, _ceil_to(H1, 128))
    Ip = _ceil_to(I, 8)
    OUTP = 128

    # fold (b_ih + b_hh) into every row of W_ih: exactly one row is selected
    # per step (one-hot input), so row[tok] carries the full bias.
    wih = jnp.zeros((Ip, Lp), jnp.float32).at[:I, :GL].set(
        params["w_ih"] + params["b"])
    # rows >= H MUST stay zero: lanes [H:Lp) of the carried h are don't-care.
    whh = jnp.zeros((Lp, Lp), jnp.float32).at[:H, :GL].set(params["w_hh"])
    w1 = jnp.zeros((Lp, H1p), jnp.float32).at[:H, :H1].set(params["w1"])
    b1 = jnp.zeros((1, H1p), jnp.float32).at[:, :H1].set(params["b1"])
    w2 = jnp.zeros((H1p, OUTP), jnp.float32).at[:H1, 0:1].set(params["w2"])
    b2 = jnp.zeros((1, OUTP), jnp.float32).at[:, 0:1].set(params["b2"])
    return dict(w_ih=wih, w_hh=whh, w1=w1, b1=b1, w2=w2, b2=b2)


def lstm_forward(tokens, hidden, params, hidden_size, max_length):
    """tokens: int (B, L); hidden = (h0, c0) each (1, 1, H).

    Matches the PyTorch module: the whole batch is flattened into ONE
    sequence of length S = B*L (that is what return_hotone does)."""
    H = hidden_size
    H1 = H // 2
    I = max_length
    GL = 4 * H
    Lp = max(128, _ceil_to(GL, 128))
    H1p = max(128, _ceil_to(H1, 128))
    OUTP = 128
    h0, c0 = hidden

    # clamp: an out-of-range token would otherwise silently gather a wrong row
    flat = jnp.clip(tokens.reshape(-1).astype(jnp.int32), 0, I - 1)
    S = flat.shape[0]
    Sp0 = _ceil_to(S, 8)
    HT = Sp0 if Sp0 <= 256 else 256          # head row tile
    Sp = _ceil_to(Sp0, HT)

    kp = pack_params(params, hidden_size, max_length)
    h0p = jnp.zeros((1, Lp), jnp.float32).at[:, :H].set(h0.reshape(1, H))
    c0p = jnp.zeros((1, Lp), jnp.float32).at[:, :H].set(c0.reshape(1, H))

    vmem = pl.BlockSpec(memory_space=pltpu.MemorySpace.VMEM)
    smem = pl.BlockSpec(memory_space=pltpu.MemorySpace.SMEM)

    # ---- kernel 1: serial recurrence (gridless) ----
    rec_bytes = 4 * (kp["w_ih"].size + kp["w_hh"].size + 4 * Lp
                     + Sp * Lp + 10 * Lp) + 4 * S
    rec_vmem = int(min(max(2 * rec_bytes, 16 << 20) + (2 << 20), 96 << 20))

    hs_slab, hn_p, cn_p = pl.pallas_call(
        _make_lstm_kernel(S, Sp, H, Lp),
        out_shape=(
            jax.ShapeDtypeStruct((Sp, Lp), jnp.float32),   # hidden-state slab
            jax.ShapeDtypeStruct((1, Lp), jnp.float32),    # h_n (padded)
            jax.ShapeDtypeStruct((1, Lp), jnp.float32),    # c_n (padded)
        ),
        in_specs=[
            smem,   # token ids
            vmem,   # w_ih (+ bias folded), gate-compacted
            vmem,   # w_hh, gate-compacted, rows >= H zero
            vmem,   # h0 padded
            vmem,   # c0 padded
        ],
        out_specs=(vmem, vmem, vmem),
        scratch_shapes=[
            pltpu.VMEM((1, Lp), jnp.float32),   # h state
            pltpu.VMEM((1, Lp), jnp.float32),   # c state
            pltpu.VMEM((8, Lp), jnp.float32),   # 8-row store tile
        ],
        compiler_params=pltpu.CompilerParams(vmem_limit_bytes=rec_vmem),
        cost_estimate=pl.CostEstimate(
            flops=int(S * (2 * Lp * Lp + 10 * Lp)),
            transcendentals=int(S * 3 * Lp),
            bytes_accessed=int(rec_bytes)),
    )(flat, kp["w_ih"], kp["w_hh"], h0p, c0p)

    # ---- kernel 2: output head, gridded over row tiles (parallel) ----
    head_bytes = 4 * (Sp * Lp + Lp * H1p + H1p + H1p * OUTP + OUTP + Sp * OUTP)
    head_vmem = int(min(max(4 * (2 * HT * (Lp + OUTP) + Lp * H1p
                                 + H1p * OUTP + 2 * OUTP), 16 << 20)
                        + (2 << 20), 96 << 20))

    out_slab = pl.pallas_call(
        _head_kernel,
        out_shape=jax.ShapeDtypeStruct((Sp, OUTP), jnp.float32),
        grid=(Sp // HT,),
        in_specs=[
            pl.BlockSpec((HT, Lp), lambda i: (i, 0)),
            pl.BlockSpec((Lp, H1p), lambda i: (0, 0)),
            pl.BlockSpec((1, H1p), lambda i: (0, 0)),
            pl.BlockSpec((H1p, OUTP), lambda i: (0, 0)),
            pl.BlockSpec((1, OUTP), lambda i: (0, 0)),
        ],
        out_specs=pl.BlockSpec((HT, OUTP), lambda i: (i, 0)),
        compiler_params=pltpu.CompilerParams(
            dimension_semantics=("parallel",),
            vmem_limit_bytes=head_vmem),
        cost_estimate=pl.CostEstimate(
            flops=int(2 * Sp * (Lp * H1p + H1p * OUTP)),
            transcendentals=0,
            bytes_accessed=int(head_bytes)),
    )(hs_slab, kp["w1"], kp["b1"], kp["w2"], kp["b2"])

    # match PyTorch shapes: output (1, S, 1), hidden each (1, 1, H)
    out = out_slab[:S, 0].reshape(1, S, 1)
    hn = hn_p[:, :H].reshape(1, 1, H)
    cn = cn_p[:, :H].reshape(1, 1, H)
    return out, (hn, cn)


def lstm_forward_ref(tokens, hidden, params, hidden_size, max_length):
    """Pure-JAX reference mirroring torch semantics (gate order i,f,g,o)."""
    H = hidden_size
    h0, c0 = hidden
    x = jax.nn.one_hot(tokens.reshape(-1), max_length, dtype=jnp.float32)

    def step(carry, x_t):
        h, c = carry
        gates = x_t[None, :] @ params["w_ih"] + h @ params["w_hh"] + params["b"]
        i = jax.nn.sigmoid(gates[:, 0 * H:1 * H])
        f = jax.nn.sigmoid(gates[:, 1 * H:2 * H])
        g = jnp.tanh(gates[:, 2 * H:3 * H])
        o = jax.nn.sigmoid(gates[:, 3 * H:4 * H])
        c = f * c + i * g
        h = o * jnp.tanh(c)
        return (h, c), h[0]

    (hn, cn), hs = lax.scan(step, (h0.reshape(1, H), c0.reshape(1, H)), x)
    hs = jnp.maximum(hs, 0.0)
    z1 = jnp.maximum(hs @ params["w1"] + params["b1"], 0.0)
    z2 = z1 @ params["w2"] + params["b2"]
    return z2.reshape(1, -1, 1), (hn.reshape(1, 1, H), cn.reshape(1, 1, H))


if __name__ == "__main__":
    hidden_size = 32
    max_length = 16
    batch, seq = 2, 4

    key = jax.random.PRNGKey(0)
    k_tok, k_par = jax.random.split(key)
    tokens = jax.random.randint(k_tok, (batch, seq), 0, max_length, jnp.int32)
    params = init_params(k_par, hidden_size, max_length)

    # initHidden()
    h0 = jnp.zeros((1, 1, hidden_size), jnp.float32)
    c0 = jnp.zeros((1, 1, hidden_size), jnp.float32)

    out, (hn, cn) = lstm_forward(tokens, (h0, c0), params,
                                 hidden_size, max_length)
    jax.block_until_ready((out, hn, cn))

    out_r, (hn_r, cn_r) = lstm_forward_ref(tokens, (h0, c0), params,
                                           hidden_size, max_length)
    assert out.shape == (1, batch * seq, 1)
    assert hn.shape == (1, 1, hidden_size) and cn.shape == (1, 1, hidden_size)
    assert jnp.allclose(out, out_r, rtol=1e-4, atol=1e-4)
    assert jnp.allclose(hn, hn_r, rtol=1e-4, atol=1e-4)
    assert jnp.allclose(cn, cn_r, rtol=1e-4, atol=1e-4)

    print("KERNEL_OK")
</pallas_src>

<mosaic_0001>
module attributes {stable_mosaic.version = 11 : i64} {
  func.func @kernel(%arg0: memref<8xi32, #tpu.memory_space<smem>>, %arg1: memref<16x128xf32, #tpu.memory_space<vmem>>, %arg2: memref<128x128xf32, #tpu.memory_space<vmem>>, %arg3: memref<1x128xf32, #tpu.memory_space<vmem>>, %arg4: memref<1x128xf32, #tpu.memory_space<vmem>>, %arg5: memref<8x128xf32, #tpu.memory_space<vmem>>, %arg6: memref<1x128xf32, #tpu.memory_space<vmem>>, %arg7: memref<1x128xf32, #tpu.memory_space<vmem>>, %arg8: memref<1x128xf32, #tpu.memory_space<vmem>>, %arg9: memref<1x128xf32, #tpu.memory_space<vmem>>, %arg10: memref<8x128xf32, #tpu.memory_space<vmem>>) attributes {dimension_semantics = [], scalar_prefetch = 0 : i64, scratch_operands = 3 : i64, tpu.core_type = #tpu.core_type<tc>} {
    %c0 = arith.constant 0 : index
    %c0_0 = arith.constant 0 : index
    %0 = vector.load %arg3[%c0, %c0_0] : memref<1x128xf32, #tpu.memory_space<vmem>>, vector<1x128xf32>
    %c0_1 = arith.constant 0 : index
    %c0_2 = arith.constant 0 : index
    %1 = vector.load %arg8[%c0_1, %c0_2] : memref<1x128xf32, #tpu.memory_space<vmem>>, vector<1x128xf32>
    tpu.vector_store %arg8[%c0_1, %c0_2], %0 {strides = array<i32>} : memref<1x128xf32, #tpu.memory_space<vmem>>, vector<1x128xf32>,
    %c0_3 = arith.constant 0 : index
    %c0_4 = arith.constant 0 : index
    %2 = vector.load %arg4[%c0_3, %c0_4] : memref<1x128xf32, #tpu.memory_space<vmem>>, vector<1x128xf32>
    %c0_5 = arith.constant 0 : index
    %c0_6 = arith.constant 0 : index
    %3 = vector.load %arg9[%c0_5, %c0_6] : memref<1x128xf32, #tpu.memory_space<vmem>>, vector<1x128xf32>
    tpu.vector_store %arg9[%c0_5, %c0_6], %2 {strides = array<i32>} : memref<1x128xf32, #tpu.memory_space<vmem>>, vector<1x128xf32>,
    %c0_i32 = arith.constant 0 : i32
    %c8_i32 = arith.constant 8 : i32
    %4 = arith.muli %c0_i32, %c8_i32 : i32
    %5 = tpu.assume_multiple %4, 8 : i32
    %c0_i32_7 = arith.constant 0 : i32
    %6 = arith.addi %5, %c0_i32_7 : i32
    %7 = arith.index_cast %6 : i32 to index
    %8 = memref.load %arg0[%7] : memref<8xi32, #tpu.memory_space<smem>>
    %9 = arith.index_cast %8 : i32 to index
    %c0_8 = arith.constant 0 : index
    %10 = vector.load %arg1[%9, %c0_8] : memref<16x128xf32, #tpu.memory_space<vmem>>, vector<1x128xf32>
    %c0_9 = arith.constant 0 : index
    %c0_10 = arith.constant 0 : index
    %11 = vector.load %arg8[%c0_9, %c0_10] : memref<1x128xf32, #tpu.memory_space<vmem>>, vector<1x128xf32>
    %c0_11 = arith.constant 0 : index
    %c0_12 = arith.constant 0 : index
    %12 = vector.load %arg2[%c0_11, %c0_12] : memref<128x128xf32, #tpu.memory_space<vmem>>, vector<128x128xf32>
    %cst = arith.constant dense<0.000000e+00> : vector<1x128xf32>
    %13 = tpu.matmul %11, %12, %cst {dimension_numbers = #tpu.dot_dimension_numbers<[1], [0], [0], [1], [0, 0, 1, 1], [], []>} : vector<1x128xf32>, vector<128x128xf32>, vector<1x128xf32> -> vector<1x128xf32>
    %14 = arith.addf %10, %13 : vector<1x128xf32>
    %15 = arith.negf %14 : vector<1x128xf32>
    %16 = math.exp %15 : vector<1x128xf32>
    %cst_13 = arith.constant 1.000000e+00 : f32
    %17 = vector.broadcast %cst_13 : f32 to vector<1x128xf32>
    %18 = arith.addf %17, %16 : vector<1x128xf32>
    %19 = arith.divf %17, %18 : vector<1x128xf32>
    %20 = math.tanh %14 : vector<1x128xf32>
    %c96_i32 = arith.constant 96 : i32
    %21 = tpu.dynamic_rotate %19 by %c96_i32 dim 1 : vector<1x128xf32>, i32 -> vector<1x128xf32>
    %c64_i32 = arith.constant 64 : i32
    %22 = tpu.dynamic_rotate %20 by %c64_i32 dim 1 : vector<1x128xf32>, i32 -> vector<1x128xf32>
    %c32_i32 = arith.constant 32 : i32
    %23 = tpu.dynamic_rotate %19 by %c32_i32 dim 1 : vector<1x128xf32>, i32 -> vector<1x128xf32>
    %c0_14 = arith.constant 0 : index
    %c0_15 = arith.constant 0 : index
    %24 = vector.load %arg9[%c0_14, %c0_15] : memref<1x128xf32, #tpu.memory_space<vmem>>, vector<1x128xf32>
    %25 = arith.mulf %21, %24 : vector<1x128xf32>
    %26 = arith.mulf %19, %22 : vector<1x128xf32>
    %27 = arith.addf %25, %26 : vector<1x128xf32>
    %28 = math.tanh %27 : vector<1x128xf32>
    %29 = arith.mulf %23, %28 : vector<1x128xf32>
    %c0_16 = arith.constant 0 : index
    %c0_17 = arith.constant 0 : index
    %30 = vector.load %arg9[%c0_16, %c0_17] : memref<1x128xf32, #tpu.memory_space<vmem>>, vector<1x128xf32>
    tpu.vector_store %arg9[%c0_16, %c0_17], %27 {strides = array<i32>} : memref<1x128xf32, #tpu.memory_space<vmem>>, vector<1x128xf32>,
    %c0_18 = arith.constant 0 : index
    %c0_19 = arith.constant 0 : index
    %31 = vector.load %arg8[%c0_18, %c0_19] : memref<1x128xf32, #tpu.memory_space<vmem>>, vector<1x128xf32>
    tpu.vector_store %arg8[%c0_18, %c0_19], %29 {strides = array<i32>} : memref<1x128xf32, #tpu.memory_space<vmem>>, vector<1x128xf32>,
    %c0_20 = arith.constant 0 : index
    %c0_21 = arith.constant 0 : index
    %32 = vector.load %arg10[%c0_20, %c0_21] : memref<8x128xf32, #tpu.memory_space<vmem>>, vector<1x128xf32>
    tpu.vector_store %arg10[%c0_20, %c0_21], %29 {strides = array<i32>} : memref<8x128xf32, #tpu.memory_space<vmem>>, vector<1x128xf32>,
    %c1_i32 = arith.constant 1 : i32
    %33 = arith.addi %5, %c1_i32 : i32
    %34 = arith.index_cast %33 : i32 to index
    %35 = memref.load %arg0[%34] : memref<8xi32, #tpu.memory_space<smem>>
    %36 = arith.index_cast %35 : i32 to index
    %c0_22 = arith.constant 0 : index
    %37 = vector.load %arg1[%36, %c0_22] : memref<16x128xf32, #tpu.memory_space<vmem>>, vector<1x128xf32>
    %c0_23 = arith.constant 0 : index
    %c0_24 = arith.constant 0 : index
    %38 = vector.load %arg8[%c0_23, %c0_24] : memref<1x128xf32, #tpu.memory_space<vmem>>, vector<1x128xf32>
    %c0_25 = arith.constant 0 : index
    %c0_26 = arith.constant 0 : index
    %39 = vector.load %arg2[%c0_25, %c0_26] : memref<128x128xf32, #tpu.memory_space<vmem>>, vector<128x128xf32>
    %cst_27 = arith.constant dense<0.000000e+00> : vector<1x128xf32>
    %40 = tpu.matmul %38, %39, %cst_27 {dimension_numbers = #tpu.dot_dimension_numbers<[1], [0], [0], [1], [0, 0, 1, 1], [], []>} : vector<1x128xf32>, vector<128x128xf32>, vector<1x128xf32> -> vector<1x128xf32>
    %41 = arith.addf %37, %40 : vector<1x128xf32>
    %42 = arith.negf %41 : vector<1x128xf32>
    %43 = math.exp %42 : vector<1x128xf32>
    %cst_28 = arith.constant 1.000000e+00 : f32
    %44 = vector.broadcast %cst_28 : f32 to vector<1x128xf32>
    %45 = arith.addf %44, %43 : vector<1x128xf32>
    %46 = arith.divf %44, %45 : vector<1x128xf32>
    %47 = math.tanh %41 : vector<1x128xf32>
    %c96_i32_29 = arith.constant 96 : i32
    %48 = tpu.dynamic_rotate %46 by %c96_i32_29 dim 1 : vector<1x128xf32>, i32 -> vector<1x128xf32>
    %c64_i32_30 = arith.constant 64 : i32
    %49 = tpu.dynamic_rotate %47 by %c64_i32_30 dim 1 : vector<1x128xf32>, i32 -> vector<1x128xf32>
    %c32_i32_31 = arith.constant 32 : i32
    %50 = tpu.dynamic_rotate %46 by %c32_i32_31 dim 1 : vector<1x128xf32>, i32 -> vector<1x128xf32>
    %c0_32 = arith.constant 0 : index
    %c0_33 = arith.constant 0 : index
    %51 = vector.load %arg9[%c0_32, %c0_33] : memref<1x128xf32, #tpu.memory_space<vmem>>, vector<1x128xf32>
    %52 = arith.mulf %48, %51 : vector<1x128xf32>
    %53 = arith.mulf %46, %49 : vector<1x128xf32>
    %54 = arith.addf %52, %53 : vector<1x128xf32>
    %55 = math.tanh %54 : vector<1x128xf32>
    %56 = arith.mulf %50, %55 : vector<1x128xf32>
    %c0_34 = arith.constant 0 : index
    %c0_35 = arith.constant 0 : index
    %57 = vector.load %arg9[%c0_34, %c0_35] : memref<1x128xf32, #tpu.memory_space<vmem>>, vector<1x128xf32>
    tpu.vector_store %arg9[%c0_34, %c0_35], %54 {strides = array<i32>} : memref<1x128xf32, #tpu.memory_space<vmem>>, vector<1x128xf32>,
    %c0_36 = arith.constant 0 : index
    %c0_37 = arith.constant 0 : index
    %58 = vector.load %arg8[%c0_36, %c0_37] : memref<1x128xf32, #tpu.memory_space<vmem>>, vector<1x128xf32>
    tpu.vector_store %arg8[%c0_36, %c0_37], %56 {strides = array<i32>} : memref<1x128xf32, #tpu.memory_space<vmem>>, vector<1x128xf32>,
    %c1 = arith.constant 1 : index
    %c0_38 = arith.constant 0 : index
    %59 = vector.load %arg10[%c1, %c0_38] : memref<8x128xf32, #tpu.memory_space<vmem>>, vector<1x128xf32>
    tpu.vector_store %arg10[%c1, %c0_38], %56 {strides = array<i32>} : memref<8x128xf32, #tpu.memory_space<vmem>>, vector<1x128xf32>,
    %c2_i32 = arith.constant 2 : i32
    %60 = arith.addi %5, %c2_i32 : i32
    %61 = arith.index_cast %60 : i32 to index
    %62 = memref.load %arg0[%61] : memref<8xi32, #tpu.memory_space<smem>>
    %63 = arith.index_cast %62 : i32 to index
    %c0_39 = arith.constant 0 : index
    %64 = vector.load %arg1[%63, %c0_39] : memref<16x128xf32, #tpu.memory_space<vmem>>, vector<1x128xf32>
    %c0_40 = arith.constant 0 : index
    %c0_41 = arith.constant 0 : index
    %65 = vector.load %arg8[%c0_40, %c0_41] : memref<1x128xf32, #tpu.memory_space<vmem>>, vector<1x128xf32>
    %c0_42 = arith.constant 0 : index
    %c0_43 = arith.constant 0 : index
    %66 = vector.load %arg2[%c0_42, %c0_43] : memref<128x128xf32, #tpu.memory_space<vmem>>, vector<128x128xf32>
    %cst_44 = arith.constant dense<0.000000e+00> : vector<1x128xf32>
    %67 = tpu.matmul %65, %66, %cst_44 {dimension_numbers = #tpu.dot_dimension_numbers<[1], [0], [0], [1], [0, 0, 1, 1], [], []>} : vector<1x128xf32>, vector<128x128xf32>, vector<1x128xf32> -> vector<1x128xf32>
    %68 = arith.addf %64, %67 : vector<1x128xf32>
    %69 = arith.negf %68 : vector<1x128xf32>
    %70 = math.exp %69 : vector<1x128xf32>
    %cst_45 = arith.constant 1.000000e+00 : f32
    %71 = vector.broadcast %cst_45 : f32 to vector<1x128xf32>
    %72 = arith.addf %71, %70 : vector<1x128xf32>
    %73 = arith.divf %71, %72 : vector<1x128xf32>
    %74 = math.tanh %68 : vector<1x128xf32>
    %c96_i32_46 = arith.constant 96 : i32
    %75 = tpu.dynamic_rotate %73 by %c96_i32_46 dim 1 : vector<1x128xf32>, i32 -> vector<1x128xf32>
    %c64_i32_47 = arith.constant 64 : i32
    %76 = tpu.dynamic_rotate %74 by %c64_i32_47 dim 1 : vector<1x128xf32>, i32 -> vector<1x128xf32>
    %c32_i32_48 = arith.constant 32 : i32
    %77 = tpu.dynamic_rotate %73 by %c32_i32_48 dim 1 : vector<1x128xf32>, i32 -> vector<1x128xf32>
    %c0_49 = arith.constant 0 : index
    %c0_50 = arith.constant 0 : index
    %78 = vector.load %arg9[%c0_49, %c0_50] : memref<1x128xf32, #tpu.memory_space<vmem>>, vector<1x128xf32>
    %79 = arith.mulf %75, %78 : vector<1x128xf32>
    %80 = arith.mulf %73, %76 : vector<1x128xf32>
    %81 = arith.addf %79, %80 : vector<1x128xf32>
    %82 = math.tanh %81 : vector<1x128xf32>
    %83 = arith.mulf %77, %82 : vector<1x128xf32>
    %c0_51 = arith.constant 0 : index
    %c0_52 = arith.constant 0 : index
    %84 = vector.load %arg9[%c0_51, %c0_52] : memref<1x128xf32, #tpu.memory_space<vmem>>, vector<1x128xf32>
    tpu.vector_store %arg9[%c0_51, %c0_52], %81 {strides = array<i32>} : memref<1x128xf32, #tpu.memory_space<vmem>>, vector<1x128xf32>,
    %c0_53 = arith.constant 0 : index
    %c0_54 = arith.constant 0 : index
    %85 = vector.load %arg8[%c0_53, %c0_54] : memref<1x128xf32, #tpu.memory_space<vmem>>, vector<1x128xf32>
    tpu.vector_store %arg8[%c0_53, %c0_54], %83 {strides = array<i32>} : memref<1x128xf32, #tpu.memory_space<vmem>>, vector<1x128xf32>,
    %c2 = arith.constant 2 : index
    %c0_55 = arith.constant 0 : index
    %86 = vector.load %arg10[%c2, %c0_55] : memref<8x128xf32, #tpu.memory_space<vmem>>, vector<1x128xf32>
    tpu.vector_store %arg10[%c2, %c0_55], %83 {strides = array<i32>} : memref<8x128xf32, #tpu.memory_space<vmem>>, vector<1x128xf32>,
    %c3_i32 = arith.constant 3 : i32
    %87 = arith.addi %5, %c3_i32 : i32
    %88 = arith.index_cast %87 : i32 to index
    %89 = memref.load %arg0[%88] : memref<8xi32, #tpu.memory_space<smem>>
    %90 = arith.index_cast %89 : i32 to index
    %c0_56 = arith.constant 0 : index
    %91 = vector.load %arg1[%90, %c0_56] : memref<16x128xf32, #tpu.memory_space<vmem>>, vector<1x128xf32>
    %c0_57 = arith.constant 0 : index
    %c0_58 = arith.constant 0 : index
    %92 = vector.load %arg8[%c0_57, %c0_58] : memref<1x128xf32, #tpu.memory_space<vmem>>, vector<1x128xf32>
    %c0_59 = arith.constant 0 : index
    %c0_60 = arith.constant 0 : index
    %93 = vector.load %arg2[%c0_59, %c0_60] : memref<128x128xf32, #tpu.memory_space<vmem>>, vector<128x128xf32>
    %cst_61 = arith.constant dense<0.000000e+00> : vector<1x128xf32>
    %94 = tpu.matmul %92, %93, %cst_61 {dimension_numbers = #tpu.dot_dimension_numbers<[1], [0], [0], [1], [0, 0, 1, 1], [], []>} : vector<1x128xf32>, vector<128x128xf32>, vector<1x128xf32> -> vector<1x128xf32>
    %95 = arith.addf %91, %94 : vector<1x128xf32>
    %96 = arith.negf %95 : vector<1x128xf32>
    %97 = math.exp %96 : vector<1x128xf32>
    %cst_62 = arith.constant 1.000000e+00 : f32
    %98 = vector.broadcast %cst_62 : f32 to vector<1x128xf32>
    %99 = arith.addf %98, %97 : vector<1x128xf32>
    %100 = arith.divf %98, %99 : vector<1x128xf32>
    %101 = math.tanh %95 : vector<1x128xf32>
    %c96_i32_63 = arith.constant 96 : i32
    %102 = tpu.dynamic_rotate %100 by %c96_i32_63 dim 1 : vector<1x128xf32>, i32 -> vector<1x128xf32>
    %c64_i32_64 = arith.constant 64 : i32
    %103 = tpu.dynamic_rotate %101 by %c64_i32_64 dim 1 : vector<1x128xf32>, i32 -> vector<1x128xf32>
    %c32_i32_65 = arith.constant 32 : i32
    %104 = tpu.dynamic_rotate %100 by %c32_i32_65 dim 1 : vector<1x128xf32>, i32 -> vector<1x128xf32>
    %c0_66 = arith.constant 0 : index
    %c0_67 = arith.constant 0 : index
    %105 = vector.load %arg9[%c0_66, %c0_67] : memref<1x128xf32, #tpu.memory_space<vmem>>, vector<1x128xf32>
    %106 = arith.mulf %102, %105 : vector<1x128xf32>
    %107 = arith.mulf %100, %103 : vector<1x128xf32>
    %108 = arith.addf %106, %107 : vector<1x128xf32>
    %109 = math.tanh %108 : vector<1x128xf32>
    %110 = arith.mulf %104, %109 : vector<1x128xf32>
    %c0_68 = arith.constant 0 : index
    %c0_69 = arith.constant 0 : index
    %111 = vector.load %arg9[%c0_68, %c0_69] : memref<1x128xf32, #tpu.memory_space<vmem>>, vector<1x128xf32>
    tpu.vector_store %arg9[%c0_68, %c0_69], %108 {strides = array<i32>} : memref<1x128xf32, #tpu.memory_space<vmem>>, vector<1x128xf32>,
    %c0_70 = arith.constant 0 : index
    %c0_71 = arith.constant 0 : index
    %112 = vector.load %arg8[%c0_70, %c0_71] : memref<1x128xf32, #tpu.memory_space<vmem>>, vector<1x128xf32>
    tpu.vector_store %arg8[%c0_70, %c0_71], %110 {strides = array<i32>} : memref<1x128xf32, #tpu.memory_space<vmem>>, vector<1x128xf32>,
    %c3 = arith.constant 3 : index
    %c0_72 = arith.constant 0 : index
    %113 = vector.load %arg10[%c3, %c0_72] : memref<8x128xf32, #tpu.memory_space<vmem>>, vector<1x128xf32>
    tpu.vector_store %arg10[%c3, %c0_72], %110 {strides = array<i32>} : memref<8x128xf32, #tpu.memory_space<vmem>>, vector<1x128xf32>,
    %c4_i32 = arith.constant 4 : i32
    %114 = arith.addi %5, %c4_i32 : i32
    %115 = arith.index_cast %114 : i32 to index
    %116 = memref.load %arg0[%115] : memref<8xi32, #tpu.memory_space<smem>>
    %117 = arith.index_cast %116 : i32 to index
    %c0_73 = arith.constant 0 : index
    %118 = vector.load %arg1[%117, %c0_73] : memref<16x128xf32, #tpu.memory_space<vmem>>, vector<1x128xf32>
    %c0_74 = arith.constant 0 : index
    %c0_75 = arith.constant 0 : index
    %119 = vector.load %arg8[%c0_74, %c0_75] : memref<1x128xf32, #tpu.memory_space<vmem>>, vector<1x128xf32>
    %c0_76 = arith.constant 0 : index
    %c0_77 = arith.constant 0 : index
    %120 = vector.load %arg2[%c0_76, %c0_77] : memref<128x128xf32, #tpu.memory_space<vmem>>, vector<128x128xf32>
    %cst_78 = arith.constant dense<0.000000e+00> : vector<1x128xf32>
    %121 = tpu.matmul %119, %120, %cst_78 {dimension_numbers = #tpu.dot_dimension_numbers<[1], [0], [0], [1], [0, 0, 1, 1], [], []>} : vector<1x128xf32>, vector<128x128xf32>, vector<1x128xf32> -> vector<1x128xf32>
    %122 = arith.addf %118, %121 : vector<1x128xf32>
    %123 = arith.negf %122 : vector<1x128xf32>
    %124 = math.exp %123 : vector<1x128xf32>
    %cst_79 = arith.constant 1.000000e+00 : f32
    %125 = vector.broadcast %cst_79 : f32 to vector<1x128xf32>
    %126 = arith.addf %125, %124 : vector<1x128xf32>
    %127 = arith.divf %125, %126 : vector<1x128xf32>
    %128 = math.tanh %122 : vector<1x128xf32>
    %c96_i32_80 = arith.constant 96 : i32
    %129 = tpu.dynamic_rotate %127 by %c96_i32_80 dim 1 : vector<1x128xf32>, i32 -> vector<1x128xf32>
    %c64_i32_81 = arith.constant 64 : i32
    %130 = tpu.dynamic_rotate %128 by %c64_i32_81 dim 1 : vector<1x128xf32>, i32 -> vector<1x128xf32>
    %c32_i32_82 = arith.constant 32 : i32
    %131 = tpu.dynamic_rotate %127 by %c32_i32_82 dim 1 : vector<1x128xf32>, i32 -> vector<1x128xf32>
    %c0_83 = arith.constant 0 : index
    %c0_84 = arith.constant 0 : index
    %132 = vector.load %arg9[%c0_83, %c0_84] : memref<1x128xf32, #tpu.memory_space<vmem>>, vector<1x128xf32>
    %133 = arith.mulf %129, %132 : vector<1x128xf32>
    %134 = arith.mulf %127, %130 : vector<1x128xf32>
    %135 = arith.addf %133, %134 : vector<1x128xf32>
    %136 = math.tanh %135 : vector<1x128xf32>
    %137 = arith.mulf %131, %136 : vector<1x128xf32>
    %c0_85 = arith.constant 0 : index
    %c0_86 = arith.constant 0 : index
    %138 = vector.load %arg9[%c0_85, %c0_86] : memref<1x128xf32, #tpu.memory_space<vmem>>, vector<1x128xf32>
    tpu.vector_store %arg9[%c0_85, %c0_86], %135 {strides = array<i32>} : memref<1x128xf32, #tpu.memory_space<vmem>>, vector<1x128xf32>,
    %c0_87 = arith.constant 0 : index
    %c0_88 = arith.constant 0 : index
    %139 = vector.load %arg8[%c0_87, %c0_88] : memref<1x128xf32, #tpu.memory_space<vmem>>, vector<1x128xf32>
    tpu.vector_store %arg8[%c0_87, %c0_88], %137 {strides = array<i32>} : memref<1x128xf32, #tpu.memory_space<vmem>>, vector<1x128xf32>,
    %c4 = arith.constant 4 : index
    %c0_89 = arith.constant 0 : index
    %140 = vector.load %arg10[%c4, %c0_89] : memref<8x128xf32, #tpu.memory_space<vmem>>, vector<1x128xf32>
    tpu.vector_store %arg10[%c4, %c0_89], %137 {strides = array<i32>} : memref<8x128xf32, #tpu.memory_space<vmem>>, vector<1x128xf32>,
    %c5_i32 = arith.constant 5 : i32
    %141 = arith.addi %5, %c5_i32 : i32
    %142 = arith.index_cast %141 : i32 to index
    %143 = memref.load %arg0[%142] : memref<8xi32, #tpu.memory_space<smem>>
    %144 = arith.index_cast %143 : i32 to index
    %c0_90 = arith.constant 0 : index
    %145 = vector.load %arg1[%144, %c0_90] : memref<16x128xf32, #tpu.memory_space<vmem>>, vector<1x128xf32>
    %c0_91 = arith.constant 0 : index
    %c0_92 = arith.constant 0 : index
    %146 = vector.load %arg8[%c0_91, %c0_92] : memref<1x128xf32, #tpu.memory_space<vmem>>, vector<1x128xf32>
    %c0_93 = arith.constant 0 : index
    %c0_94 = arith.constant 0 : index
    %147 = vector.load %arg2[%c0_93, %c0_94] : memref<128x128xf32, #tpu.memory_space<vmem>>, vector<128x128xf32>
    %cst_95 = arith.constant dense<0.000000e+00> : vector<1x128xf32>
    %148 = tpu.matmul %146, %147, %cst_95 {dimension_numbers = #tpu.dot_dimension_numbers<[1], [0], [0], [1], [0, 0, 1, 1], [], []>} : vector<1x128xf32>, vector<128x128xf32>, vector<1x128xf32> -> vector<1x128xf32>
    %149 = arith.addf %145, %148 : vector<1x128xf32>
    %150 = arith.negf %149 : vector<1x128xf32>
    %151 = math.exp %150 : vector<1x128xf32>
    %cst_96 = arith.constant 1.000000e+00 : f32
    %152 = vector.broadcast %cst_96 : f32 to vector<1x128xf32>
    %153 = arith.addf %152, %151 : vector<1x128xf32>
    %154 = arith.divf %152, %153 : vector<1x128xf32>
    %155 = math.tanh %149 : vector<1x128xf32>
    %c96_i32_97 = arith.constant 96 : i32
    %156 = tpu.dynamic_rotate %154 by %c96_i32_97 dim 1 : vector<1x128xf32>, i32 -> vector<1x128xf32>
    %c64_i32_98 = arith.constant 64 : i32
    %157 = tpu.dynamic_rotate %155 by %c64_i32_98 dim 1 : vector<1x128xf32>, i32 -> vector<1x128xf32>
    %c32_i32_99 = arith.constant 32 : i32
    %158 = tpu.dynamic_rotate %154 by %c32_i32_99 dim 1 : vector<1x128xf32>, i32 -> vector<1x128xf32>
    %c0_100 = arith.constant 0 : index
    %c0_101 = arith.constant 0 : index
    %159 = vector.load %arg9[%c0_100, %c0_101] : memref<1x128xf32, #tpu.memory_space<vmem>>, vector<1x128xf32>
    %160 = arith.mulf %156, %159 : vector<1x128xf32>
    %161 = arith.mulf %154, %157 : vector<1x128xf32>
    %162 = arith.addf %160, %161 : vector<1x128xf32>
    %163 = math.tanh %162 : vector<1x128xf32>
    %164 = arith.mulf %158, %163 : vector<1x128xf32>
    %c0_102 = arith.constant 0 : index
    %c0_103 = arith.constant 0 : index
    %165 = vector.load %arg9[%c0_102, %c0_103] : memref<1x128xf32, #tpu.memory_space<vmem>>, vector<1x128xf32>
    tpu.vector_store %arg9[%c0_102, %c0_103], %162 {strides = array<i32>} : memref<1x128xf32, #tpu.memory_space<vmem>>, vector<1x128xf32>,
    %c0_104 = arith.constant 0 : index
    %c0_105 = arith.constant 0 : index
    %166 = vector.load %arg8[%c0_104, %c0_105] : memref<1x128xf32, #tpu.memory_space<vmem>>, vector<1x128xf32>
    tpu.vector_store %arg8[%c0_104, %c0_105], %164 {strides = array<i32>} : memref<1x128xf32, #tpu.memory_space<vmem>>, vector<1x128xf32>,
    %c5 = arith.constant 5 : index
    %c0_106 = arith.constant 0 : index
    %167 = vector.load %arg10[%c5, %c0_106] : memref<8x128xf32, #tpu.memory_space<vmem>>, vector<1x128xf32>
    tpu.vector_store %arg10[%c5, %c0_106], %164 {strides = array<i32>} : memref<8x128xf32, #tpu.memory_space<vmem>>, vector<1x128xf32>,
    %c6_i32 = arith.constant 6 : i32
    %168 = arith.addi %5, %c6_i32 : i32
    %169 = arith.index_cast %168 : i32 to index
    %170 = memref.load %arg0[%169] : memref<8xi32, #tpu.memory_space<smem>>
    %171 = arith.index_cast %170 : i32 to index
    %c0_107 = arith.constant 0 : index
    %172 = vector.load %arg1[%171, %c0_107] : memref<16x128xf32, #tpu.memory_space<vmem>>, vector<1x128xf32>
    %c0_108 = arith.constant 0 : index
    %c0_109 = arith.constant 0 : index
    %173 = vector.load %arg8[%c0_108, %c0_109] : memref<1x128xf32, #tpu.memory_space<vmem>>, vector<1x128xf32>
    %c0_110 = arith.constant 0 : index
    %c0_111 = arith.constant 0 : index
    %174 = vector.load %arg2[%c0_110, %c0_111] : memref<128x128xf32, #tpu.memory_space<vmem>>, vector<128x128xf32>
    %cst_112 = arith.constant dense<0.000000e+00> : vector<1x128xf32>
    %175 = tpu.matmul %173, %174, %cst_112 {dimension_numbers = #tpu.dot_dimension_numbers<[1], [0], [0], [1], [0, 0, 1, 1], [], []>} : vector<1x128xf32>, vector<128x128xf32>, vector<1x128xf32> -> vector<1x128xf32>
    %176 = arith.addf %172, %175 : vector<1x128xf32>
    %177 = arith.negf %176 : vector<1x128xf32>
    %178 = math.exp %177 : vector<1x128xf32>
    %cst_113 = arith.constant 1.000000e+00 : f32
    %179 = vector.broadcast %cst_113 : f32 to vector<1x128xf32>
    %180 = arith.addf %179, %178 : vector<1x128xf32>
    %181 = arith.divf %179, %180 : vector<1x128xf32>
    %182 = math.tanh %176 : vector<1x128xf32>
    %c96_i32_114 = arith.constant 96 : i32
    %183 = tpu.dynamic_rotate %181 by %c96_i32_114 dim 1 : vector<1x128xf32>, i32 -> vector<1x128xf32>
    %c64_i32_115 = arith.constant 64 : i32
    %184 = tpu.dynamic_rotate %182 by %c64_i32_115 dim 1 : vector<1x128xf32>, i32 -> vector<1x128xf32>
    %c32_i32_116 = arith.constant 32 : i32
    %185 = tpu.dynamic_rotate %181 by %c32_i32_116 dim 1 : vector<1x128xf32>, i32 -> vector<1x128xf32>
    %c0_117 = arith.constant 0 : index
    %c0_118 = arith.constant 0 : index
    %186 = vector.load %arg9[%c0_117, %c0_118] : memref<1x128xf32, #tpu.memory_space<vmem>>, vector<1x128xf32>
    %187 = arith.mulf %183, %186 : vector<1x128xf32>
    %188 = arith.mulf %181, %184 : vector<1x128xf32>
    %189 = arith.addf %187, %188 : vector<1x128xf32>
    %190 = math.tanh %189 : vector<1x128xf32>
    %191 = arith.mulf %185, %190 : vector<1x128xf32>
    %c0_119 = arith.constant 0 : index
    %c0_120 = arith.constant 0 : index
    %192 = vector.load %arg9[%c0_119, %c0_120] : memref<1x128xf32, #tpu.memory_space<vmem>>, vector<1x128xf32>
    tpu.vector_store %arg9[%c0_119, %c0_120], %189 {strides = array<i32>} : memref<1x128xf32, #tpu.memory_space<vmem>>, vector<1x128xf32>,
    %c0_121 = arith.constant 0 : index
    %c0_122 = arith.constant 0 : index
    %193 = vector.load %arg8[%c0_121, %c0_122] : memref<1x128xf32, #tpu.memory_space<vmem>>, vector<1x128xf32>
    tpu.vector_store %arg8[%c0_121, %c0_122], %191 {strides = array<i32>} : memref<1x128xf32, #tpu.memory_space<vmem>>, vector<1x128xf32>,
    %c6 = arith.constant 6 : index
    %c0_123 = arith.constant 0 : index
    %194 = vector.load %arg10[%c6, %c0_123] : memref<8x128xf32, #tpu.memory_space<vmem>>, vector<1x128xf32>
    tpu.vector_store %arg10[%c6, %c0_123], %191 {strides = array<i32>} : memref<8x128xf32, #tpu.memory_space<vmem>>, vector<1x128xf32>,
    %c7_i32 = arith.constant 7 : i32
    %195 = arith.addi %5, %c7_i32 : i32
    %196 = arith.index_cast %195 : i32 to index
    %197 = memref.load %arg0[%196] : memref<8xi32, #tpu.memory_space<smem>>
    %198 = arith.index_cast %197 : i32 to index
    %c0_124 = arith.constant 0 : index
    %199 = vector.load %arg1[%198, %c0_124] : memref<16x128xf32, #tpu.memory_space<vmem>>, vector<1x128xf32>
    %c0_125 = arith.constant 0 : index
    %c0_126 = arith.constant 0 : index
    %200 = vector.load %arg8[%c0_125, %c0_126] : memref<1x128xf32, #tpu.memory_space<vmem>>, vector<1x128xf32>
    %c0_127 = arith.constant 0 : index
    %c0_128 = arith.constant 0 : index
    %201 = vector.load %arg2[%c0_127, %c0_128] : memref<128x128xf32, #tpu.memory_space<vmem>>, vector<128x128xf32>
    %cst_129 = arith.constant dense<0.000000e+00> : vector<1x128xf32>
    %202 = tpu.matmul %200, %201, %cst_129 {dimension_numbers = #tpu.dot_dimension_numbers<[1], [0], [0], [1], [0, 0, 1, 1], [], []>} : vector<1x128xf32>, vector<128x128xf32>, vector<1x128xf32> -> vector<1x128xf32>
    %203 = arith.addf %199, %202 : vector<1x128xf32>
    %204 = arith.negf %203 : vector<1x128xf32>
    %205 = math.exp %204 : vector<1x128xf32>
    %cst_130 = arith.constant 1.000000e+00 : f32
    %206 = vector.broadcast %cst_130 : f32 to vector<1x128xf32>
    %207 = arith.addf %206, %205 : vector<1x128xf32>
    %208 = arith.divf %206, %207 : vector<1x128xf32>
    %209 = math.tanh %203 : vector<1x128xf32>
    %c96_i32_131 = arith.constant 96 : i32
    %210 = tpu.dynamic_rotate %208 by %c96_i32_131 dim 1 : vector<1x128xf32>, i32 -> vector<1x128xf32>
    %c64_i32_132 = arith.constant 64 : i32
    %211 = tpu.dynamic_rotate %209 by %c64_i32_132 dim 1 : vector<1x128xf32>, i32 -> vector<1x128xf32>
    %c32_i32_133 = arith.constant 32 : i32
    %212 = tpu.dynamic_rotate %208 by %c32_i32_133 dim 1 : vector<1x128xf32>, i32 -> vector<1x128xf32>
    %c0_134 = arith.constant 0 : index
    %c0_135 = arith.constant 0 : index
    %213 = vector.load %arg9[%c0_134, %c0_135] : memref<1x128xf32, #tpu.memory_space<vmem>>, vector<1x128xf32>
    %214 = arith.mulf %210, %213 : vector<1x128xf32>
    %215 = arith.mulf %208, %211 : vector<1x128xf32>
    %216 = arith.addf %214, %215 : vector<1x128xf32>
    %217 = math.tanh %216 : vector<1x128xf32>
    %218 = arith.mulf %212, %217 : vector<1x128xf32>
    %c0_136 = arith.constant 0 : index
    %c0_137 = arith.constant 0 : index
    %219 = vector.load %arg9[%c0_136, %c0_137] : memref<1x128xf32, #tpu.memory_space<vmem>>, vector<1x128xf32>
    tpu.vector_store %arg9[%c0_136, %c0_137], %216 {strides = array<i32>} : memref<1x128xf32, #tpu.memory_space<vmem>>, vector<1x128xf32>,
    %c0_138 = arith.constant 0 : index
    %c0_139 = arith.constant 0 : index
    %220 = vector.load %arg8[%c0_138, %c0_139] : memref<1x128xf32, #tpu.memory_space<vmem>>, vector<1x128xf32>
    tpu.vector_store %arg8[%c0_138, %c0_139], %218 {strides = array<i32>} : memref<1x128xf32, #tpu.memory_space<vmem>>, vector<1x128xf32>,
    %c7 = arith.constant 7 : index
    %c0_140 = arith.constant 0 : index
    %221 = vector.load %arg10[%c7, %c0_140] : memref<8x128xf32, #tpu.memory_space<vmem>>, vector<1x128xf32>
    tpu.vector_store %arg10[%c7, %c0_140], %218 {strides = array<i32>} : memref<8x128xf32, #tpu.memory_space<vmem>>, vector<1x128xf32>,
    %c0_141 = arith.constant 0 : index
    %c0_142 = arith.constant 0 : index
    %222 = vector.load %arg10[%c0_141, %c0_142] : memref<8x128xf32, #tpu.memory_space<vmem>>, vector<8x128xf32>
    %223 = arith.index_cast %5 : i32 to index
    %c0_143 = arith.constant 0 : index
    %224 = vector.load %arg5[%223, %c0_143] : memref<8x128xf32, #tpu.memory_space<vmem>>, vector<8x128xf32>
    tpu.vector_store %arg5[%223, %c0_143], %222 {strides = array<i32>} : memref<8x128xf32, #tpu.memory_space<vmem>>, vector<8x128xf32>,
    %c1_i32_144 = arith.constant 1 : i32
    %c0_145 = arith.constant 0 : index
    %c0_146 = arith.constant 0 : index
    %225 = vector.load %arg8[%c0_145, %c0_146] : memref<1x128xf32, #tpu.memory_space<vmem>>, vector<1x128xf32>
    %c0_147 = arith.constant 0 : index
    %c0_148 = arith.constant 0 : index
    %226 = vector.load %arg6[%c0_147, %c0_148] : memref<1x128xf32, #tpu.memory_space<vmem>>, vector<1x128xf32>
    tpu.vector_store %arg6[%c0_147, %c0_148], %225 {strides = array<i32>} : memref<1x128xf32, #tpu.memory_space<vmem>>, vector<1x128xf32>,
    %c0_149 = arith.constant 0 : index
    %c0_150 = arith.constant 0 : index
    %227 = vector.load %arg9[%c0_149, %c0_150] : memref<1x128xf32, #tpu.memory_space<vmem>>, vector<1x128xf32>
    %c0_151 = arith.constant 0 : index
    %c0_152 = arith.constant 0 : index
    %228 = vector.load %arg7[%c0_151, %c0_152] : memref<1x128xf32, #tpu.memory_space<vmem>>, vector<1x128xf32>
    tpu.vector_store %arg7[%c0_151, %c0_152], %227 {strides = array<i32>} : memref<1x128xf32, #tpu.memory_space<vmem>>, vector<1x128xf32>,
    return
  }
}

</mosaic_0001>

<bundles_post_ra>
// kernel: tpu_custom_call.1
= control target key start
LH: loop header
LB: loop body
LE: loop exit
PB: predicated region body
PF: predicated region fallthrough
CT: control target
= control target key end

     0   :  { %13 = vsyncpa [#allocation8], 0  ;;  %s1244_s0 = inlined_call_operand.hbm [shape: s32[8], index: 0, kind: input, shape index: {}]   ;;  %s1245_s1 = inlined_call_operand.hbm [shape: f32[16,128], index: 1, kind: input, shape index: {}]   ;;  %s1246_s2 = inlined_call_operand.hbm [shape: f32[128,128], index: 2, kind: input, shape index: {}]   ;;  %s1247_s3 = inlined_call_operand.vmem [shape: f32[1,128], index: 3, kind: input, shape index: {}]   ;;  %s1248_s4 = inlined_call_operand.vmem [shape: f32[1,128], index: 4, kind: input, shape index: {}]   ;;  %s1249_s5 = inlined_call_operand.hbm [shape: f32[8,128], index: 5, kind: output, shape index: {0}]   ;;  %s1250_s6 = inlined_call_operand.hbm [shape: f32[1,128], index: 6, kind: output, shape index: {1}]   ;;  %s1251_s7 = inlined_call_operand.hbm [shape: f32[1,128], index: 7, kind: output, shape index: {2}]  }
   0x1   :  { %14 = vsyncpa [#allocation6], 0 }
   0x2   :  { %15 = vsyncpa [#allocation11], 0 }
   0x3   :  { %16 = vsyncpa [#allocation7], 0 }
   0x4   :  { %17 = vsyncpa [#allocation14], 0  ;;  %s23_s26 = sshll.u32 %s1244_s0, 4  ;;  %s31_s29 = sshll.u32 %s1245_s1, 4  ;;  %s24_s26 = int_to_ptr.hbm [resolvable:$true] %s23_s26  ;;  %s32_s29 = int_to_ptr.hbm [resolvable:$true] %s31_s29 }
   0x5   :  { %s985_s30 = smov [#allocation5]   ;;  %s986_s8 = smov [#allocation9]  }
   0x6   :  { %26 = dma.hbm_to_smem %s24_s26, 16, %s985_s30, [#allocation8]  }
   0x7   :  { %s33_s9 = sshll.u32 %s986_s8, 4  ;;  %s987_s10 = smov 128   ;;  %s34_s9 = int_to_ptr.vmem [resolvable:$true] %s33_s9 }
   0x8   :  { %s988_s11 = smov 8   ;;  %s44_s14 = sshll.u32 %s1246_s2, 4  ;;  %s45_s14 = int_to_ptr.hbm [resolvable:$true] %s44_s14 }
   0x9   :  { %39 = dma.hbm_to_vmem [thread:$0]  %s32_s29, 256, %s34_s9, [#allocation6], %s987_s10, %s987_s10, %s988_s11  }
   0xa   :  { %s989_s0 = smov [#allocation10]  }
   0xb   :  { %s46_s15 = sshll.u32 %s989_s0, 4  ;;  %s47_s15 = int_to_ptr.vmem [resolvable:$true] %s46_s15 }
   0xc   :  { %52 = dma.hbm_to_vmem [thread:$0]  %s45_s14, 2048, %s47_s15, [#allocation11], %s987_s10, %s987_s10, %s988_s11  }
   0xd   :  { %975 = dma.done.wait [#allocation8], 16  }
   0xe   :  { %976 = vsyncadd [#allocation8], 4294967280 }
   0xf   :  { %977 = dma.done.wait [#allocation6], 256  }
  0x10   :  { %978 = vsyncadd [#allocation6], 4294967040 }
  0x11   :  { %979 = dma.done.wait [#allocation11], 2048  }
  0x12   :  { %980 = vsyncadd [#allocation11], 4294965248 }
  0x13   :  { %69 = sfence }
  0x14   :  { %v1045_v0 = vld [vmem:[#allocation10 + $0x78] sm:$0xff]  ;;  %v1047_v1 = vld [vmem:[#allocation10 + $0x70] sm:$0xff]  ;;  %v1051_v2 = vld [vmem:[#allocation10 + $0x68] sm:$0xff]  ;;  %s990_s17 = smov 32   ;;  %s991_s18 = smov 96  }
  0x15   :  { %94 = vmatpush.msra.mxu0 %v1045_v0  ;;  %171 = vmatpush.msra.mxu1 %v1045_v0  ;;  %v1057_v3 = vld [vmem:[#allocation10 + $0x60] sm:$0xff]  ;;  %v1066_v5 = vld [vmem:[#allocation10 + $0x58] sm:$0xff]  ;;  %v1072_v6 = vld [vmem:[#allocation10 + $0x50] sm:$0xff]  ;;  %s992_s19 = smov 64   ;;  %s754_s22 = sld [smem:[#allocation5 + $0x1]] }
  0x16   :  { %248 = vmatpush.msra.mxu2 %v1045_v0  ;;  %325 = vmatpush.msra.mxu3 %v1045_v0  ;;  %v70_v4 = vld [vmem:[%s1247_s3] sm:$0x1]  ;;  %v1078_v7 = vld [vmem:[#allocation10 + $0x48] sm:$0xff]  ;;  %v1090_v9 = vld [vmem:[#allocation10 + $0x38] sm:$0xff]  ;;  %s74_s3 = sld [smem:[#allocation5]]  ;;  %s993_s12 = smov [#allocation12]  }
  0x17   :  { %95 = vmatpush.msra.mxu0 %v1047_v1  ;;  %172 = vmatpush.msra.mxu1 %v1047_v1  ;;  %71 = vst [vmem:[#allocation2] sm:$0x1] %v70_v4  ;;  %v1084_v8 = vld [vmem:[#allocation10 + $0x40] sm:$0xff]  ;;  %v1096_v10 = vld [vmem:[#allocation10 + $0x30] sm:$0xff]  ;;  %v1102_v11 = vld [vmem:[#allocation10 + $0x28] sm:$0xff]  ;;  %s758_s25 = sld [smem:[#allocation5 + $0x3]] }
  0x18   :  { %249 = vmatpush.msra.mxu2 %v1047_v1  ;;  %326 = vmatpush.msra.mxu3 %v1047_v1  ;;  %v1108_v12 = vld [vmem:[#allocation10 + $0x20] sm:$0xff]  ;;  %v1114_v13 = vld [vmem:[#allocation10 + $0x18] sm:$0xff]  ;;  %v1120_v14 = vld [vmem:[#allocation10 + $0x10] sm:$0xff]  ;;  %s760_s27 = sld [smem:[#allocation5 + $0x4]]  ;;  %s700_s13 = sshll.u32 %s993_s12, 4  ;;  %s701_s13 = int_to_ptr.vmem [resolvable:$true] %s700_s13 }
  0x19   :  { %96 = vmatpush.msra.mxu0 %v1051_v2  ;;  %173 = vmatpush.msra.mxu1 %v1051_v2  ;;  %v1126_v15 = vld [vmem:[#allocation10 + $0x8] sm:$0xff]  ;;  %v1132_v16 = vld [vmem:[#allocation10] sm:$0xff]  ;;  %s762_s29 = sld [smem:[#allocation5 + $0x5]]  ;;  %s702_s15 = sshll.u32 %s1249_s5, 4  ;;  %s703_s15 = int_to_ptr.hbm [resolvable:$true] %s702_s15 }
  0x1a   :  { %250 = vmatpush.msra.mxu2 %v1051_v2  ;;  %327 = vmatpush.msra.mxu3 %v1051_v2  ;;  %v72_v35 = vld [vmem:[%s1248_s4] sm:$0x1]  ;;  %s756_s4 = sld [smem:[#allocation5 + $0x2]]  ;;  %s994_s1 = smov [#allocation13]  }
  0x1b   :  { %97 = vmatpush.msra.mxu0 %v1057_v3  ;;  %174 = vmatpush.msra.mxu1 %v1057_v3  ;;  %73 = vst [vmem:[#allocation3] sm:$0x1] %v72_v35  ;;  %s152_s23 = scalar_lea.vmem [#allocation9], %s754_s22  ;;  %s764_s8 = sld [smem:[#allocation5 + $0x6]] }
  0x1c   :  { %251 = vmatpush.msra.mxu2 %v1057_v3  ;;  %328 = vmatpush.msra.mxu3 %v1057_v3  ;;  %s75_s16 = scalar_lea.vmem [#allocation9], %s74_s3  ;;  %v153_v46 = vld [vmem:[%s152_s23] sm:$0x1]  ;;  %s766_s10 = sld [smem:[#allocation5 + $0x7]] }
  0x1d   :  { %98 = vmatpush.msra.mxu0 %v1066_v5  ;;  %175 = vmatpush.msra.mxu1 %v1066_v5  ;;  %v76_v18 = vld [vmem:[%s75_s16] sm:$0x1]  ;;  %s306_s26 = scalar_lea.vmem [#allocation9], %s758_s25  ;;  %s711_s2 = sshll.u32 %s994_s1, 4  ;;  %s712_s2 = int_to_ptr.vmem [resolvable:$true] %s711_s2 }
  0x1e   :  { %252 = vmatpush.msra.mxu2 %v1066_v5  ;;  %329 = vmatpush.msra.mxu3 %v1066_v5  ;;  %v77_v17 = vld [vmem:[#allocation2] sm:$0x1]  ;;  %s383_s28 = scalar_lea.vmem [#allocation9], %s760_s27  ;;  %s724_s22 = sshll.u32 %s1251_s7, 4  ;;  %s725_s22 = int_to_ptr.hbm [resolvable:$true] %s724_s22 }
  0x1f   :  { %99 = vmatpush.msra.mxu0 %v1072_v6  ;;  %176 = vmatpush.msra.mxu1 %v1072_v6  ;;  %s460_s30 = scalar_lea.vmem [#allocation9], %s762_s29 }
  0x20   :  { %253 = vmatpush.msra.mxu2 %v1072_v6  ;;  %330 = vmatpush.msra.mxu3 %v1072_v6  ;;  %s229_s24 = scalar_lea.vmem [#allocation9], %s756_s4 }
  0x21   :  { %100 = vmatpush.msra.mxu0 %v1078_v7  ;;  %177 = vmatpush.msra.mxu1 %v1078_v7  ;;  %s537_s9 = scalar_lea.vmem [#allocation9], %s764_s8 }
  0x22   :  { %254 = vmatpush.msra.mxu2 %v1078_v7  ;;  %331 = vmatpush.msra.mxu3 %v1078_v7  ;;  %v141_v37 = vld [vmem:[#allocation3] sm:$0x1]  ;;  %s614_s11 = scalar_lea.vmem [#allocation9], %s766_s10 }
  0x23   :  { %101 = vmatpush.msra.mxu0 %v1084_v8  ;;  %178 = vmatpush.msra.mxu1 %v1084_v8 }
  0x24   :  { %255 = vmatpush.msra.mxu2 %v1084_v8  ;;  %332 = vmatpush.msra.mxu3 %v1084_v8 }
  0x25   :  { %102 = vmatpush.msra.mxu0 %v1090_v9  ;;  %179 = vmatpush.msra.mxu1 %v1090_v9 }
  0x26   :  { %256 = vmatpush.msra.mxu2 %v1090_v9  ;;  %333 = vmatpush.msra.mxu3 %v1090_v9 }
  0x27   :  { %103 = vmatpush.msra.mxu0 %v1096_v10  ;;  %180 = vmatpush.msra.mxu1 %v1096_v10 }
  0x28   :  { %257 = vmatpush.msra.mxu2 %v1096_v10  ;;  %334 = vmatpush.msra.mxu3 %v1096_v10 }
  0x29   :  { %104 = vmatpush.msra.mxu0 %v1102_v11  ;;  %181 = vmatpush.msra.mxu1 %v1102_v11 }
  0x2a   :  { %258 = vmatpush.msra.mxu2 %v1102_v11  ;;  %335 = vmatpush.msra.mxu3 %v1102_v11 }
  0x2b   :  { %105 = vmatpush.msra.mxu0 %v1108_v12  ;;  %182 = vmatpush.msra.mxu1 %v1108_v12 }
  0x2c   :  { %259 = vmatpush.msra.mxu2 %v1108_v12  ;;  %336 = vmatpush.msra.mxu3 %v1108_v12 }
  0x2d   :  { %106 = vmatpush.msra.mxu0 %v1114_v13  ;;  %183 = vmatpush.msra.mxu1 %v1114_v13 }
  0x2e   :  { %260 = vmatpush.msra.mxu2 %v1114_v13  ;;  %337 = vmatpush.msra.mxu3 %v1114_v13 }
  0x2f   :  { %107 = vmatpush.msra.mxu0 %v1120_v14  ;;  %184 = vmatpush.msra.mxu1 %v1120_v14 }
  0x30   :  { %261 = vmatpush.msra.mxu2 %v1120_v14  ;;  %338 = vmatpush.msra.mxu3 %v1120_v14 }
  0x31   :  { %108 = vmatpush.msra.mxu0 %v1126_v15  ;;  %185 = vmatpush.msra.mxu1 %v1126_v15 }
  0x32   :  { %262 = vmatpush.msra.mxu2 %v1126_v15  ;;  %339 = vmatpush.msra.mxu3 %v1126_v15 }
  0x33   :  { %109 = vmatpush.msra.mxu0 %v1132_v16  ;;  %186 = vmatpush.msra.mxu1 %v1132_v16 }
  0x34   :  { %110 = vmatmul.f32.vlgmr.msra.gmra.mxu0 %v77_v17  ;;  %263 = vmatpush.msra.mxu2 %v1132_v16 }
  0x35   :  { %340 = vmatpush.msra.mxu3 %v1132_v16  ;;  %402 = vmatpush.msrb.mxu0 %v1045_v0 }
  0x36   :  { %479 = vmatpush.msrb.mxu1 %v1045_v0  ;;  %556 = vmatpush.msrb.mxu2 %v1045_v0 }
  0x37   :  { %403 = vmatpush.msrb.mxu0 %v1047_v1  ;;  %633 = vmatpush.msrb.mxu3 %v1045_v0 }
  0x38   :  { %480 = vmatpush.msrb.mxu1 %v1047_v1  ;;  %557 = vmatpush.msrb.mxu2 %v1047_v1 }
  0x39   :  { %404 = vmatpush.msrb.mxu0 %v1051_v2  ;;  %634 = vmatpush.msrb.mxu3 %v1047_v1 }
  0x3a   :  { %481 = vmatpush.msrb.mxu1 %v1051_v2  ;;  %558 = vmatpush.msrb.mxu2 %v1051_v2 }
  0x3b   :  { %405 = vmatpush.msrb.mxu0 %v1057_v3  ;;  %635 = vmatpush.msrb.mxu3 %v1051_v2 }
  0x3c   :  { %482 = vmatpush.msrb.mxu1 %v1057_v3  ;;  %559 = vmatpush.msrb.mxu2 %v1057_v3 }
  0x3d   :  { %406 = vmatpush.msrb.mxu0 %v1066_v5  ;;  %636 = vmatpush.msrb.mxu3 %v1057_v3 }
  0x3e   :  { %483 = vmatpush.msrb.mxu1 %v1066_v5  ;;  %560 = vmatpush.msrb.mxu2 %v1066_v5 }
  0x3f   :  { %407 = vmatpush.msrb.mxu0 %v1072_v6  ;;  %637 = vmatpush.msrb.mxu3 %v1066_v5 }
  0x40   :  { %484 = vmatpush.msrb.mxu1 %v1072_v6  ;;  %561 = vmatpush.msrb.mxu2 %v1072_v6 }
  0x41   :  { %408 = vmatpush.msrb.mxu0 %v1078_v7  ;;  %638 = vmatpush.msrb.mxu3 %v1072_v6 }
  0x42   :  { %485 = vmatpush.msrb.mxu1 %v1078_v7  ;;  %562 = vmatpush.msrb.mxu2 %v1078_v7 }
  0x43   :  { %409 = vmatpush.msrb.mxu0 %v1084_v8  ;;  %639 = vmatpush.msrb.mxu3 %v1078_v7 }
  0x44   :  { %486 = vmatpush.msrb.mxu1 %v1084_v8  ;;  %563 = vmatpush.msrb.mxu2 %v1084_v8 }
  0x45   :  { %410 = vmatpush.msrb.mxu0 %v1090_v9  ;;  %640 = vmatpush.msrb.mxu3 %v1084_v8 }
  0x46   :  { %487 = vmatpush.msrb.mxu1 %v1090_v9  ;;  %564 = vmatpush.msrb.mxu2 %v1090_v9 }
  0x47   :  { %411 = vmatpush.msrb.mxu0 %v1096_v10  ;;  %641 = vmatpush.msrb.mxu3 %v1090_v9  ;;  %v230_v9 = vld [vmem:[%s229_s24] sm:$0x1] }
  0x48   :  { %488 = vmatpush.msrb.mxu1 %v1096_v10  ;;  %565 = vmatpush.msrb.mxu2 %v1096_v10 }
  0x49   :  { %412 = vmatpush.msrb.mxu0 %v1102_v11  ;;  %642 = vmatpush.msrb.mxu3 %v1096_v10 }
  0x4a   :  { %489 = vmatpush.msrb.mxu1 %v1102_v11  ;;  %566 = vmatpush.msrb.mxu2 %v1102_v11 }
  0x4b   :  { %413 = vmatpush.msrb.mxu0 %v1108_v12  ;;  %643 = vmatpush.msrb.mxu3 %v1102_v11 }
  0x4c   :  { %490 = vmatpush.msrb.mxu1 %v1108_v12  ;;  %567 = vmatpush.msrb.mxu2 %v1108_v12 }
  0x4d   :  { %414 = vmatpush.msrb.mxu0 %v1114_v13  ;;  %644 = vmatpush.msrb.mxu3 %v1108_v12 }
  0x4e   :  { %491 = vmatpush.msrb.mxu1 %v1114_v13  ;;  %568 = vmatpush.msrb.mxu2 %v1114_v13 }
  0x4f   :  { %415 = vmatpush.msrb.mxu0 %v1120_v14  ;;  %645 = vmatpush.msrb.mxu3 %v1114_v13 }
  0x50   :  { %492 = vmatpush.msrb.mxu1 %v1120_v14  ;;  %569 = vmatpush.msrb.mxu2 %v1120_v14 }
  0x51   :  { %416 = vmatpush.msrb.mxu0 %v1126_v15  ;;  %646 = vmatpush.msrb.mxu3 %v1120_v14 }
  0x52   :  { %493 = vmatpush.msrb.mxu1 %v1126_v15  ;;  %570 = vmatpush.msrb.mxu2 %v1126_v15 }
  0x53   :  { %417 = vmatpush.msrb.mxu0 %v1132_v16  ;;  %647 = vmatpush.msrb.mxu3 %v1126_v15 }
  0x54   :  { %494 = vmatpush.msrb.mxu1 %v1132_v16  ;;  %571 = vmatpush.msrb.mxu2 %v1132_v16 }
  0x55   :  { %648 = vmatpush.msrb.mxu3 %v1132_v16 }
  0xb1   :  { %v111_v19 = vpop.f32.mrf.mxu0 }
  0xb2   :  { %v114_v20 = vadd.f32 %v111_v19, %v76_v18 }
  0xb4   :  { %v753_v21 = vmul.f32 -1.442695, %v114_v20 }
  0xb6   :  { %779 = vpow2.f32 %v753_v21 }
  0xbc   :  { %v780_v22 = vpop.eup %779 }
  0xbd   :  { %v118_v23 = vadd.f32 1.0, %v780_v22 }
  0xbf   :  { %781 = vrcp.f32 %v118_v23  ;;  %v130_v27 = vand.u32 2147483648, %v118_v23  ;;  %v128_v29 = vand.u32 2147483647, %v118_v23  ;;  %vm124_vm1 = vweird.f32 %v118_v23 }
  0xc0   :  { %783 = vtanh.f32 %v114_v20 }
  0xc1   :  { %v131_v31 = vor.u32 1.1754944e-38, %v130_v27  ;;  %vm129_vm3 = vcmp.eq.f32.partialorder %v128_v29, 8.507059e+37 }
  0xc5   :  { %v782_v24 = vpop.eup %781 }
  0xc6   :  { %v120_v25 = vmul.f32 %v782_v24, %v118_v23  ;;  %vm125_vm0 = vweird.f32 %v782_v24  ;;  %v784_v34 = vpop.eup %783 }
  0xc7   :  { %vm126_vm2 = vmor %vm124_vm1, %vm125_vm0 }
  0xc8   :  { %v121_v26 = vsub.f32 1.0, %v120_v25 }
  0xca   :  { %v122_v28 = vmul.f32 %v782_v24, %v121_v26 }
  0xcc   :  { %v123_v30 = vadd.f32 %v782_v24, %v122_v28 }
  0xce   :  { %v127_v32 = vsel %vm126_vm2, %v782_v24, %v123_v30 }
  0xcf   :  { %v132_v33 = vsel %vm129_vm3, %v131_v31, %v127_v32 }
  0xd0   :  { %139 = vrot.lane.b32.xlu1 %v132_v33, %s990_s17  ;;  %135 = vrot.lane.b32.xlu0 %v132_v33, %s991_s18 }
  0xd8   :  { %137 = vrot.lane.b32.xlu0 %v784_v34, %s992_s19 }
 0x142   :  { %v136_v36 = vpop.permute.xlu0 %135  ;;  %v140_v43 = vpop.permute.xlu1 %139 }
 0x143   :  { %v142_v39 = vmul.f32 %v141_v37, %v136_v36  ;;  %v307_v36 = vld [vmem:[%s306_s26] sm:$0x1] }
 0x14a   :  { %v138_v38 = vpop.permute.xlu0 %137 }
 0x14b   :  { %v143_v40 = vmul.f32 %v138_v38, %v132_v33 }
 0x14d   :  { %v144_v41 = vadd.f32 %v143_v40, %v142_v39 }
 0x14f   :  { %785 = vtanh.f32 %v144_v41  ;;  %147 = vst [vmem:[#allocation3] sm:$0x1] %v144_v41 }
 0x155   :  { %v786_v42 = vpop.eup %785 }
 0x156   :  { %v146_v44 = vmul.f32 %v786_v42, %v140_v43  ;;  %v218_v0 = vld [vmem:[#allocation3] sm:$0x1] }
 0x158   :  { %148 = vst [vmem:[#allocation2] sm:$0x1] %v146_v44 }
 0x159   :  { %149 = vst [vmem:[#allocation4] sm:$0x1] %v146_v44 }
 0x15f   :  { %v154_v45 = vld [vmem:[#allocation2] sm:$0x1] }
 0x160   :  { %187 = vmatmul.f32.vlgmr.msra.gmra.mxu1 %v154_v45 }
 0x1dd   :  { %v188_v47 = vpop.f32.mrf.mxu1 }
 0x1de   :  { %v191_v48 = vadd.f32 %v188_v47, %v153_v46 }
 0x1e0   :  { %v755_v49 = vmul.f32 -1.442695, %v191_v48  ;;  %787 = vtanh.f32 %v191_v48 }
 0x1e2   :  { %789 = vpow2.f32 %v755_v49 }
 0x1e6   :  { %v788_v50 = vpop.eup %787 }
 0x1e7   :  { %214 = vrot.lane.b32.xlu2 %v788_v50, %s992_s19 }
 0x1e8   :  { %v790_v51 = vpop.eup %789 }
 0x1e9   :  { %v195_v52 = vadd.f32 1.0, %v790_v51 }
 0x1eb   :  { %791 = vrcp.f32 %v195_v52  ;;  %v207_v56 = vand.u32 2147483648, %v195_v52  ;;  %v205_v58 = vand.u32 2147483647, %v195_v52  ;;  %vm201_vm5 = vweird.f32 %v195_v52 }
 0x1ed   :  { %v208_v60 = vor.u32 1.1754944e-38, %v207_v56  ;;  %vm206_vm7 = vcmp.eq.f32.partialorder %v205_v58, 8.507059e+37 }
 0x1f1   :  { %v792_v53 = vpop.eup %791 }
 0x1f2   :  { %v197_v54 = vmul.f32 %v792_v53, %v195_v52  ;;  %vm202_vm4 = vweird.f32 %v792_v53 }
 0x1f3   :  { %vm203_vm6 = vmor %vm201_vm5, %vm202_vm4 }
 0x1f4   :  { %v198_v55 = vsub.f32 1.0, %v197_v54 }
 0x1f6   :  { %v199_v57 = vmul.f32 %v792_v53, %v198_v55 }
 0x1f8   :  { %v200_v59 = vadd.f32 %v792_v53, %v199_v57 }
 0x1fa   :  { %v204_v61 = vsel %vm203_vm6, %v792_v53, %v200_v59 }
 0x1fb   :  { %v209_v62 = vsel %vm206_vm7, %v208_v60, %v204_v61 }
 0x1fc   :  { %216 = vrot.lane.b32.xlu2 %v209_v62, %s990_s17  ;;  %212 = vrot.lane.b32.xlu1 %v209_v62, %s991_s18 }
 0x241   :  { %v215_v63 = vpop.permute.xlu2 %214 }
 0x242   :  { %v220_v2 = vmul.f32 %v215_v63, %v209_v62  ;;  %v384_v63 = vld [vmem:[%s383_s28] sm:$0x1] }
 0x256   :  { %v217_v6 = vpop.permute.xlu2 %216 }
 0x26e   :  { %v213_v1 = vpop.permute.xlu1 %212 }
 0x26f   :  { %v219_v3 = vmul.f32 %v218_v0, %v213_v1 }
 0x271   :  { %v221_v4 = vadd.f32 %v220_v2, %v219_v3 }
 0x273   :  { %793 = vtanh.f32 %v221_v4  ;;  %224 = vst [vmem:[#allocation3] sm:$0x1] %v221_v4 }
 0x279   :  { %v794_v5 = vpop.eup %793 }
 0x27a   :  { %v223_v7 = vmul.f32 %v794_v5, %v217_v6  ;;  %v295_v27 = vld [vmem:[#allocation3] sm:$0x1] }
 0x27c   :  { %225 = vst [vmem:[#allocation2] sm:$0x1] %v223_v7 }
 0x27d   :  { %226 = vst [vmem:[#allocation4 + $0x1] sm:$0x1] %v223_v7 }
 0x283   :  { %v231_v8 = vld [vmem:[#allocation2] sm:$0x1] }
 0x284   :  { %264 = vmatmul.f32.vlgmr.msra.gmra.mxu2 %v231_v8 }
 0x307   :  { %v265_v10 = vpop.f32.mrf.mxu2 }
 0x308   :  { %v268_v11 = vadd.f32 %v265_v10, %v230_v9 }
 0x30a   :  { %v757_v12 = vmul.f32 -1.442695, %v268_v11  ;;  %795 = vtanh.f32 %v268_v11 }
 0x30c   :  { %797 = vpow2.f32 %v757_v12 }
 0x310   :  { %v796_v13 = vpop.eup %795 }
 0x311   :  { %291 = vrot.lane.b32.xlu1 %v796_v13, %s992_s19 }
 0x312   :  { %v798_v14 = vpop.eup %797 }
 0x313   :  { %v272_v15 = vadd.f32 1.0, %v798_v14 }
 0x315   :  { %799 = vrcp.f32 %v272_v15  ;;  %v284_v19 = vand.u32 2147483648, %v272_v15  ;;  %v282_v21 = vand.u32 2147483647, %v272_v15  ;;  %vm278_vm9 = vweird.f32 %v272_v15 }
 0x317   :  { %v285_v23 = vor.u32 1.1754944e-38, %v284_v19  ;;  %vm283_vm11 = vcmp.eq.f32.partialorder %v282_v21, 8.507059e+37 }
 0x31b   :  { %v800_v16 = vpop.eup %799 }
 0x31c   :  { %v274_v17 = vmul.f32 %v800_v16, %v272_v15  ;;  %vm279_vm8 = vweird.f32 %v800_v16 }
 0x31d   :  { %vm280_vm10 = vmor %vm278_vm9, %vm279_vm8 }
 0x31e   :  { %v275_v18 = vsub.f32 1.0, %v274_v17 }
 0x320   :  { %v276_v20 = vmul.f32 %v800_v16, %v275_v18 }
 0x322   :  { %v277_v22 = vadd.f32 %v800_v16, %v276_v20 }
 0x324   :  { %v281_v24 = vsel %vm280_vm10, %v800_v16, %v277_v22 }
 0x325   :  { %v286_v25 = vsel %vm283_vm11, %v285_v23, %v281_v24 }
 0x326   :  { %293 = vrot.lane.b32.xlu2 %v286_v25, %s990_s17  ;;  %289 = vrot.lane.b32.xlu0 %v286_v25, %s991_s18 }
 0x380   :  { %v294_v33 = vpop.permute.xlu2 %293 }
 0x383   :  { %v292_v26 = vpop.permute.xlu1 %291 }
 0x384   :  { %v297_v29 = vmul.f32 %v292_v26, %v286_v25  ;;  %v461_v26 = vld [vmem:[%s460_s30] sm:$0x1] }
 0x398   :  { %v290_v28 = vpop.permute.xlu0 %289 }
 0x399   :  { %v296_v30 = vmul.f32 %v295_v27, %v290_v28 }
 0x39b   :  { %v298_v31 = vadd.f32 %v297_v29, %v296_v30 }
 0x39d   :  { %801 = vtanh.f32 %v298_v31  ;;  %301 = vst [vmem:[#allocation3] sm:$0x1] %v298_v31 }
 0x3a3   :  { %v802_v32 = vpop.eup %801 }
 0x3a4   :  { %v300_v34 = vmul.f32 %v802_v32, %v294_v33  ;;  %v372_v54 = vld [vmem:[#allocation3] sm:$0x1] }
 0x3a6   :  { %302 = vst [vmem:[#allocation2] sm:$0x1] %v300_v34 }
 0x3a7   :  { %303 = vst [vmem:[#allocation4 + $0x2] sm:$0x1] %v300_v34 }
 0x3ad   :  { %v308_v35 = vld [vmem:[#allocation2] sm:$0x1] }
 0x3ae   :  { %341 = vmatmul.f32.vlgmr.msra.gmra.mxu3 %v308_v35 }
 0x431   :  { %v342_v37 = vpop.f32.mrf.mxu3 }
 0x432   :  { %v345_v38 = vadd.f32 %v342_v37, %v307_v36 }
 0x434   :  { %v759_v39 = vmul.f32 -1.442695, %v345_v38  ;;  %803 = vtanh.f32 %v345_v38 }
 0x436   :  { %805 = vpow2.f32 %v759_v39 }
 0x43a   :  { %v804_v40 = vpop.eup %803 }
 0x43b   :  { %368 = vrot.lane.b32.xlu1 %v804_v40, %s992_s19 }
 0x43c   :  { %v806_v41 = vpop.eup %805 }
 0x43d   :  { %v349_v42 = vadd.f32 1.0, %v806_v41 }
 0x43f   :  { %807 = vrcp.f32 %v349_v42  ;;  %v361_v46 = vand.u32 2147483648, %v349_v42  ;;  %v359_v48 = vand.u32 2147483647, %v349_v42  ;;  %vm355_vm13 = vweird.f32 %v349_v42 }
 0x441   :  { %v362_v50 = vor.u32 1.1754944e-38, %v361_v46  ;;  %vm360_vm15 = vcmp.eq.f32.partialorder %v359_v48, 8.507059e+37 }
 0x445   :  { %v808_v43 = vpop.eup %807 }
 0x446   :  { %v351_v44 = vmul.f32 %v808_v43, %v349_v42  ;;  %vm356_vm12 = vweird.f32 %v808_v43 }
 0x447   :  { %vm357_vm14 = vmor %vm355_vm13, %vm356_vm12 }
 0x448   :  { %v352_v45 = vsub.f32 1.0, %v351_v44 }
 0x44a   :  { %v353_v47 = vmul.f32 %v808_v43, %v352_v45 }
 0x44c   :  { %v354_v49 = vadd.f32 %v808_v43, %v353_v47 }
 0x44e   :  { %v358_v51 = vsel %vm357_vm14, %v808_v43, %v354_v49 }
 0x44f   :  { %v363_v52 = vsel %vm360_vm15, %v362_v50, %v358_v51 }
 0x450   :  { %370 = vrot.lane.b32.xlu2 %v363_v52, %s990_s17  ;;  %366 = vrot.lane.b32.xlu0 %v363_v52, %s991_s18 }
 0x4aa   :  { %v371_v60 = vpop.permute.xlu2 %370 }
 0x4ad   :  { %v369_v53 = vpop.permute.xlu1 %368 }
 0x4ae   :  { %v374_v56 = vmul.f32 %v369_v53, %v363_v52  ;;  %v538_v53 = vld [vmem:[%s537_s9] sm:$0x1] }
 0x4c2   :  { %v367_v55 = vpop.permute.xlu0 %366 }
 0x4c3   :  { %v373_v57 = vmul.f32 %v372_v54, %v367_v55 }
 0x4c5   :  { %v375_v58 = vadd.f32 %v374_v56, %v373_v57 }
 0x4c7   :  { %809 = vtanh.f32 %v375_v58  ;;  %378 = vst [vmem:[#allocation3] sm:$0x1] %v375_v58 }
 0x4cd   :  { %v810_v59 = vpop.eup %809 }
 0x4ce   :  { %v377_v61 = vmul.f32 %v810_v59, %v371_v60  ;;  %v449_v17 = vld [vmem:[#allocation3] sm:$0x1] }
 0x4d0   :  { %379 = vst [vmem:[#allocation2] sm:$0x1] %v377_v61 }
 0x4d1   :  { %380 = vst [vmem:[#allocation4 + $0x3] sm:$0x1] %v377_v61 }
 0x4d7   :  { %v385_v62 = vld [vmem:[#allocation2] sm:$0x1] }
 0x4d8   :  { %418 = vmatmul.f32.vlgmr.msrb.gmra.mxu0 %v385_v62 }
 0x555   :  { %v419_v0 = vpop.f32.mrf.mxu0 }
 0x556   :  { %v422_v1 = vadd.f32 %v419_v0, %v384_v63 }
 0x558   :  { %v761_v2 = vmul.f32 -1.442695, %v422_v1  ;;  %811 = vtanh.f32 %v422_v1 }
 0x55a   :  { %813 = vpow2.f32 %v761_v2 }
 0x55e   :  { %v812_v3 = vpop.eup %811 }
 0x55f   :  { %445 = vrot.lane.b32.xlu1 %v812_v3, %s992_s19 }
 0x560   :  { %v814_v4 = vpop.eup %813 }
 0x561   :  { %v426_v5 = vadd.f32 1.0, %v814_v4 }
 0x563   :  { %815 = vrcp.f32 %v426_v5  ;;  %v438_v9 = vand.u32 2147483648, %v426_v5  ;;  %v436_v11 = vand.u32 2147483647, %v426_v5  ;;  %vm432_vm1 = vweird.f32 %v426_v5 }
 0x565   :  { %v439_v13 = vor.u32 1.1754944e-38, %v438_v9  ;;  %vm437_vm3 = vcmp.eq.f32.partialorder %v436_v11, 8.507059e+37 }
 0x569   :  { %v816_v6 = vpop.eup %815 }
 0x56a   :  { %v428_v7 = vmul.f32 %v816_v6, %v426_v5  ;;  %vm433_vm0 = vweird.f32 %v816_v6 }
 0x56b   :  { %vm434_vm2 = vmor %vm432_vm1, %vm433_vm0 }
 0x56c   :  { %v429_v8 = vsub.f32 1.0, %v428_v7 }
 0x56e   :  { %v430_v10 = vmul.f32 %v816_v6, %v429_v8 }
 0x570   :  { %v431_v12 = vadd.f32 %v816_v6, %v430_v10 }
 0x572   :  { %v435_v14 = vsel %vm434_vm2, %v816_v6, %v431_v12 }
 0x573   :  { %v440_v15 = vsel %vm437_vm3, %v439_v13, %v435_v14 }
 0x574   :  { %447 = vrot.lane.b32.xlu2 %v440_v15, %s990_s17  ;;  %443 = vrot.lane.b32.xlu0 %v440_v15, %s991_s18 }
 0x5ce   :  { %v448_v23 = vpop.permute.xlu2 %447 }
 0x5d1   :  { %v446_v16 = vpop.permute.xlu1 %445 }
 0x5d2   :  { %v451_v19 = vmul.f32 %v446_v16, %v440_v15  ;;  %v615_v16 = vld [vmem:[%s614_s11] sm:$0x1] }
 0x5e6   :  { %v444_v18 = vpop.permute.xlu0 %443 }
 0x5e7   :  { %v450_v20 = vmul.f32 %v449_v17, %v444_v18 }
 0x5e9   :  { %v452_v21 = vadd.f32 %v451_v19, %v450_v20 }
 0x5eb   :  { %817 = vtanh.f32 %v452_v21  ;;  %455 = vst [vmem:[#allocation3] sm:$0x1] %v452_v21 }
 0x5f1   :  { %v818_v22 = vpop.eup %817 }
 0x5f2   :  { %v454_v24 = vmul.f32 %v818_v22, %v448_v23  ;;  %v526_v44 = vld [vmem:[#allocation3] sm:$0x1] }
 0x5f4   :  { %457 = vst [vmem:[#allocation4 + $0x4] sm:$0x1] %v454_v24 }
 0x5f5   :  { %456 = vst [vmem:[#allocation2] sm:$0x1] %v454_v24 }
 0x5fc   :  { %v462_v25 = vld [vmem:[#allocation2] sm:$0x1] }
 0x5fd   :  { %495 = vmatmul.f32.vlgmr.msrb.gmra.mxu1 %v462_v25 }
 0x67a   :  { %v496_v27 = vpop.f32.mrf.mxu1 }
 0x67b   :  { %v499_v28 = vadd.f32 %v496_v27, %v461_v26 }
 0x67d   :  { %v763_v29 = vmul.f32 -1.442695, %v499_v28  ;;  %819 = vtanh.f32 %v499_v28 }
 0x67f   :  { %821 = vpow2.f32 %v763_v29 }
 0x683   :  { %v820_v30 = vpop.eup %819 }
 0x684   :  { %522 = vrot.lane.b32.xlu1 %v820_v30, %s992_s19 }
 0x685   :  { %v822_v31 = vpop.eup %821 }
 0x686   :  { %v503_v32 = vadd.f32 1.0, %v822_v31 }
 0x688   :  { %823 = vrcp.f32 %v503_v32  ;;  %v515_v36 = vand.u32 2147483648, %v503_v32  ;;  %v513_v38 = vand.u32 2147483647, %v503_v32  ;;  %vm509_vm5 = vweird.f32 %v503_v32 }
 0x68a   :  { %v516_v40 = vor.u32 1.1754944e-38, %v515_v36  ;;  %vm514_vm7 = vcmp.eq.f32.partialorder %v513_v38, 8.507059e+37 }
 0x68e   :  { %v824_v33 = vpop.eup %823 }
 0x68f   :  { %v505_v34 = vmul.f32 %v824_v33, %v503_v32  ;;  %vm510_vm4 = vweird.f32 %v824_v33 }
 0x690   :  { %vm511_vm6 = vmor %vm509_vm5, %vm510_vm4 }
 0x691   :  { %v506_v35 = vsub.f32 1.0, %v505_v34 }
 0x693   :  { %v507_v37 = vmul.f32 %v824_v33, %v506_v35 }
 0x695   :  { %v508_v39 = vadd.f32 %v824_v33, %v507_v37 }
 0x697   :  { %v512_v41 = vsel %vm511_vm6, %v824_v33, %v508_v39 }
 0x698   :  { %v517_v42 = vsel %vm514_vm7, %v516_v40, %v512_v41 }
 0x699   :  { %524 = vrot.lane.b32.xlu2 %v517_v42, %s990_s17  ;;  %520 = vrot.lane.b32.xlu0 %v517_v42, %s991_s18 }
 0x6f3   :  { %v525_v50 = vpop.permute.xlu2 %524 }
 0x6f6   :  { %v523_v43 = vpop.permute.xlu1 %522 }
 0x6f7   :  { %v528_v46 = vmul.f32 %v523_v43, %v517_v42 }
 0x70b   :  { %v521_v45 = vpop.permute.xlu0 %520 }
 0x70c   :  { %v527_v47 = vmul.f32 %v526_v44, %v521_v45 }
 0x70e   :  { %v529_v48 = vadd.f32 %v528_v46, %v527_v47 }
 0x710   :  { %825 = vtanh.f32 %v529_v48  ;;  %532 = vst [vmem:[#allocation3] sm:$0x1] %v529_v48 }
 0x716   :  { %v826_v49 = vpop.eup %825 }
 0x717   :  { %v531_v51 = vmul.f32 %v826_v49, %v525_v50  ;;  %v603_v7 = vld [vmem:[#allocation3] sm:$0x1] }
 0x719   :  { %534 = vst [vmem:[#allocation4 + $0x5] sm:$0x1] %v531_v51 }
 0x71a   :  { %533 = vst [vmem:[#allocation2] sm:$0x1] %v531_v51 }
 0x721   :  { %v539_v52 = vld [vmem:[#allocation2] sm:$0x1] }
 0x722   :  { %572 = vmatmul.f32.vlgmr.msrb.gmra.mxu2 %v539_v52 }
 0x7a5   :  { %v573_v54 = vpop.f32.mrf.mxu2 }
 0x7a6   :  { %v576_v55 = vadd.f32 %v573_v54, %v538_v53 }
 0x7a8   :  { %v765_v56 = vmul.f32 -1.442695, %v576_v55  ;;  %827 = vtanh.f32 %v576_v55 }
 0x7aa   :  { %829 = vpow2.f32 %v765_v56 }
 0x7ae   :  { %v828_v57 = vpop.eup %827 }
 0x7af   :  { %599 = vrot.lane.b32.xlu1 %v828_v57, %s992_s19 }
 0x7b0   :  { %v830_v58 = vpop.eup %829 }
 0x7b1   :  { %v580_v59 = vadd.f32 1.0, %v830_v58 }
 0x7b3   :  { %831 = vrcp.f32 %v580_v59  ;;  %v592_v63 = vand.u32 2147483648, %v580_v59  ;;  %v590_v1 = vand.u32 2147483647, %v580_v59  ;;  %vm586_vm9 = vweird.f32 %v580_v59 }
 0x7b5   :  { %v593_v3 = vor.u32 1.1754944e-38, %v592_v63  ;;  %vm591_vm11 = vcmp.eq.f32.partialorder %v590_v1, 8.507059e+37 }
 0x7b9   :  { %v832_v60 = vpop.eup %831 }
 0x7ba   :  { %v582_v61 = vmul.f32 %v832_v60, %v580_v59  ;;  %vm587_vm8 = vweird.f32 %v832_v60 }
 0x7bb   :  { %vm588_vm10 = vmor %vm586_vm9, %vm587_vm8 }
 0x7bc   :  { %v583_v62 = vsub.f32 1.0, %v582_v61 }
 0x7be   :  { %v584_v0 = vmul.f32 %v832_v60, %v583_v62 }
 0x7c0   :  { %v585_v2 = vadd.f32 %v832_v60, %v584_v0 }
 0x7c2   :  { %v589_v4 = vsel %vm588_vm10, %v832_v60, %v585_v2 }
 0x7c3   :  { %v594_v5 = vsel %vm591_vm11, %v593_v3, %v589_v4 }
 0x7c4   :  { %601 = vrot.lane.b32.xlu2 %v594_v5, %s990_s17  ;;  %597 = vrot.lane.b32.xlu0 %v594_v5, %s991_s18 }
 0x81e   :  { %v602_v13 = vpop.permute.xlu2 %601 }
 0x821   :  { %v600_v6 = vpop.permute.xlu1 %599 }
 0x822   :  { %v605_v9 = vmul.f32 %v600_v6, %v594_v5 }
 0x836   :  { %v598_v8 = vpop.permute.xlu0 %597 }
 0x837   :  { %v604_v10 = vmul.f32 %v603_v7, %v598_v8 }
 0x839   :  { %v606_v11 = vadd.f32 %v605_v9, %v604_v10 }
 0x83b   :  { %833 = vtanh.f32 %v606_v11  ;;  %609 = vst [vmem:[#allocation3] sm:$0x1] %v606_v11 }
 0x841   :  { %v834_v12 = vpop.eup %833 }
 0x842   :  { %v608_v14 = vmul.f32 %v834_v12, %v602_v13  ;;  %v680_v34 = vld [vmem:[#allocation3] sm:$0x1] }
 0x844   :  { %611 = vst [vmem:[#allocation4 + $0x6] sm:$0x1] %v608_v14 }
 0x845   :  { %610 = vst [vmem:[#allocation2] sm:$0x1] %v608_v14 }
 0x84c   :  { %v616_v15 = vld [vmem:[#allocation2] sm:$0x1] }
 0x84d   :  { %649 = vmatmul.f32.vlgmr.msrb.gmra.mxu3 %v616_v15 }
 0x8d0   :  { %v650_v17 = vpop.f32.mrf.mxu3 }
 0x8d1   :  { %v653_v18 = vadd.f32 %v650_v17, %v615_v16 }
 0x8d3   :  { %v767_v19 = vmul.f32 -1.442695, %v653_v18  ;;  %835 = vtanh.f32 %v653_v18 }
 0x8d5   :  { %837 = vpow2.f32 %v767_v19 }
 0x8d9   :  { %v836_v20 = vpop.eup %835 }
 0x8da   :  { %676 = vrot.lane.b32.xlu1 %v836_v20, %s992_s19 }
 0x8db   :  { %v838_v21 = vpop.eup %837 }
 0x8dc   :  { %v657_v22 = vadd.f32 1.0, %v838_v21 }
 0x8de   :  { %839 = vrcp.f32 %v657_v22  ;;  %v669_v26 = vand.u32 2147483648, %v657_v22  ;;  %v667_v28 = vand.u32 2147483647, %v657_v22  ;;  %vm663_vm13 = vweird.f32 %v657_v22 }
 0x8e0   :  { %v670_v30 = vor.u32 1.1754944e-38, %v669_v26  ;;  %vm668_vm15 = vcmp.eq.f32.partialorder %v667_v28, 8.507059e+37 }
 0x8e4   :  { %v840_v23 = vpop.eup %839 }
 0x8e5   :  { %v659_v24 = vmul.f32 %v840_v23, %v657_v22  ;;  %vm664_vm12 = vweird.f32 %v840_v23 }
 0x8e6   :  { %vm665_vm14 = vmor %vm663_vm13, %vm664_vm12 }
 0x8e7   :  { %v660_v25 = vsub.f32 1.0, %v659_v24 }
 0x8e9   :  { %v661_v27 = vmul.f32 %v840_v23, %v660_v25 }
 0x8eb   :  { %v662_v29 = vadd.f32 %v840_v23, %v661_v27 }
 0x8ed   :  { %v666_v31 = vsel %vm665_vm14, %v840_v23, %v662_v29 }
 0x8ee   :  { %v671_v32 = vsel %vm668_vm15, %v670_v30, %v666_v31 }
 0x8ef   :  { %678 = vrot.lane.b32.xlu2 %v671_v32, %s990_s17  ;;  %674 = vrot.lane.b32.xlu0 %v671_v32, %s991_s18  ;;  %s713_s17 = sshll.u32 %s1250_s6, 4  ;;  %s995_s18 = smov [#allocation15]   ;;  %s714_s17 = int_to_ptr.hbm [resolvable:$true] %s713_s17 }
 0x8f0   :  { %s722_s19 = sshll.u32 %s995_s18, 4  ;;  %s723_s19 = int_to_ptr.vmem [resolvable:$true] %s722_s19 }
 0x949   :  { %v679_v40 = vpop.permute.xlu2 %678 }
 0x94c   :  { %v677_v33 = vpop.permute.xlu1 %676 }
 0x94d   :  { %v682_v36 = vmul.f32 %v677_v33, %v671_v32 }
 0x961   :  { %v675_v35 = vpop.permute.xlu0 %674 }
 0x962   :  { %v681_v37 = vmul.f32 %v680_v34, %v675_v35 }
 0x964   :  { %v683_v38 = vadd.f32 %v682_v36, %v681_v37 }
 0x966   :  { %841 = vtanh.f32 %v683_v38  ;;  %686 = vst [vmem:[#allocation3] sm:$0x1] %v683_v38 }
 0x96c   :  { %v842_v39 = vpop.eup %841 }
 0x96d   :  { %v685_v41 = vmul.f32 %v842_v39, %v679_v40  ;;  %v693_v42 = vld [vmem:[#allocation3] sm:$0x1] }
 0x96e   :  { %694 = vst [vmem:[#allocation15] sm:$0x1] %v693_v42 }
 0x96f   :  { %688 = vst [vmem:[#allocation4 + $0x7] sm:$0x1] %v685_v41 }
 0x970   :  { %687 = vst [vmem:[#allocation2] sm:$0x1] %v685_v41 }
 0x976   :  { %v689_v43 = vld [vmem:[#allocation4] sm:$0xff] }
 0x977   :  { %v691_v44 = vld [vmem:[#allocation2] sm:$0x1]  ;;  %690 = vst [vmem:[#allocation12] sm:$0xff] %v689_v43 }
 0x978   :  { %692 = vst [vmem:[#allocation13] sm:$0x1] %v691_v44  ;;  %705 = dma.vmem_to_hbm [thread:$0]  %s701_s13, 128, %s703_s15, [#allocation7]  }
 0x979   :  { %716 = dma.vmem_to_hbm [thread:$0]  %s712_s2, 16, %s714_s17, [#allocation14]  }
 0x97a   :  { %727 = dma.vmem_to_hbm [thread:$0]  %s723_s19, 16, %s725_s22, [#allocation14]  }
 0x97b   :  { %981 = dma.done.wait [#allocation7], 128  }
 0x97c   :  { %982 = vsyncadd [#allocation7], 4294967168 }
 0x97d   :  { %983 = dma.done.wait [#allocation14], 32  }
 0x97e   :  { %984 = vsyncadd [#allocation14], 4294967264 }
 0x97f   :  { %740 = vsyncpa [#allocation6], 1 }
 0x980   :  { %741 = vsyncpa [#allocation11], 1 }
 0x981   :  { %742 = vsyncpa [#allocation7], 1 }
 0x982   :  { %743 = vsyncpa [#allocation14], 1 }
 0x983   :  { %744 = vsyncpa [#allocation8], 1 }

</bundles_post_ra>
